<compile_context>
chip_gen: v7x
topology: tpu7x:2x2x1
jax: 0.10.0
libtpu: 0.0.40
codegen_flags: <defaults>
</compile_context>

<pallas_src>
import functools

import jax
import jax.numpy as jnp
from jax.experimental import pallas as pl
from jax.experimental.pallas import tpu as pltpu

# ----------------------------- config (small) -------------------------------
DIM = 32            # dim_text = dim_speech
DIM_LATENT = 32
LAT_PAD = 128       # latent projection zero-padded to a full 128-lane width
HEADS = 4
DEPTH = 2           # text_enc_depth = speech_enc_depth
FF_MULT = 4
NUM_TEXT_TOKENS = 32
NUM_SPEECH_TOKENS = 64
TEXT_SEQ = 8
SPEECH_SEQ = 8      # must equal TEXT_SEQ for the modality-stacked fused kernel
BATCH = 2
N_MOD = 2           # modality 0 = text, 1 = speech

assert TEXT_SEQ == SPEECH_SEQ, "fused kernel stacks both modalities on one grid axis"


# ------------------------------ kernels -------------------------------------
def _layer_norm(x, g, b, eps=1e-5):
    mu = jnp.mean(x, axis=-1, keepdims=True)
    var = jnp.mean((x - mu) ** 2, axis=-1, keepdims=True)
    return (x - mu) * jax.lax.rsqrt(var + eps) * g + b


def fused_encoder_kernel(x_emb_ref, ln1g_ref, ln1b_ref, wqkv_ref, wo_ref, bo_ref,
                         ln2g_ref, ln2b_ref, w1_ref, b1_ref, w2_ref, b2_ref,
                         wlat_ref, lat_ref, x_acc, *, heads, depth):
    # TODO(synk): exact internals of the lucidrains `Transformer` used by CLVP
    # (ff mult, dropout, norm flavor) are not in this file; a standard pre-LN
    # MHA + GELU-FF encoder block with matching depth/heads/dim is used.
    l = pl.program_id(1)

    @pl.when(l == 0)
    def _():
        x_acc[...] = x_emb_ref[0].astype(jnp.float32)

    x = x_acc[...]                                 # (B, S, D) f32, VMEM-resident
    B, S, D = x.shape
    hd = D // heads
    scale = hd ** -0.5

    # --- attention (pre-LN); eval mode: mask is all ones -> no key masking ---
    h = _layer_norm(x, ln1g_ref[0, 0], ln1b_ref[0, 0])
    hf = h.reshape(B * S, D)
    qkv = jnp.dot(hf, wqkv_ref[0, 0], preferred_element_type=jnp.float32)  # (B*S, 3D)
    q = qkv[:, 0 * D:1 * D].reshape(B, S, D)
    k = qkv[:, 1 * D:2 * D].reshape(B, S, D)
    v = qkv[:, 2 * D:3 * D].reshape(B, S, D)

    # Per-head attention, statically unrolled (heads=4, head_dim=8 is sub-tile);
    # single-batch-dim einsums are the well-supported Mosaic matmul lowering.
    outs = []
    for hi in range(heads):
        sl = slice(hi * hd, (hi + 1) * hd)
        s = jnp.einsum('bqd,bkd->bqk', q[:, :, sl], k[:, :, sl],
                       preferred_element_type=jnp.float32) * scale
        s = s - jnp.max(s, axis=-1, keepdims=True)
        p = jnp.exp(s)
        p = p * pl.reciprocal(jnp.sum(p, axis=-1, keepdims=True), approx=True)
        outs.append(jnp.einsum('bqk,bkd->bqd', p, v[:, :, sl],
                               preferred_element_type=jnp.float32))
    attn = jnp.concatenate(outs, axis=-1).reshape(B * S, D)
    attn = jnp.dot(attn, wo_ref[0, 0], preferred_element_type=jnp.float32) + bo_ref[0, 0]
    x = x + attn.reshape(B, S, D)

    # --- feed-forward (pre-LN, GELU) ---
    h2 = _layer_norm(x, ln2g_ref[0, 0], ln2b_ref[0, 0]).reshape(B * S, D)
    h2 = jnp.dot(h2, w1_ref[0, 0], preferred_element_type=jnp.float32) + b1_ref[0, 0]
    h2 = jax.nn.gelu(h2)
    h2 = jnp.dot(h2, w2_ref[0, 0], preferred_element_type=jnp.float32) + b2_ref[0, 0]
    x = x + h2.reshape(B, S, D)

    x_acc[...] = x

    # --- fused CLVP pooling epilogue at the last layer of each modality ---
    @pl.when(l == depth - 1)
    def _():
        pooled = jnp.mean(x, axis=1)               # masked_mean with all-ones mask
        lat = jnp.dot(pooled, wlat_ref[0],
                      preferred_element_type=jnp.float32)       # (B, LAT_PAD)
        # F.normalize(p=2, dim=-1); padded columns are exactly zero, so the
        # 128-lane padding changes neither the norm nor the later dot product.
        inv = jax.lax.rsqrt(
            jnp.maximum(jnp.sum(lat * lat, axis=-1, keepdims=True), 1e-24))
        lat_ref[0] = lat * inv


def clvp_head_kernel(lat_ref, temp_ref, sim_ref):
    lat = lat_ref[...]                              # (2, B, LAT_PAD), normalized
    sim = jnp.sum(lat[0] * lat[1], axis=-1, keepdims=True)       # (B, 1)
    sim = sim * jnp.exp(temp_ref[...])                            # temperature.exp()
    sim_ref[...] = jnp.broadcast_to(sim, sim_ref.shape)           # lane-dense store


# ------------------------------ wrappers -------------------------------------
def run_fused_encoders(x_emb, enc, w_latent, *, heads, depth):
    n_mod, B, S, D = x_emb.shape

    def per_layer(shape):
        nd = len(shape)
        return pl.BlockSpec((1, 1) + shape[2:],
                            lambda m, l, _nd=nd: (m, l) + (0,) * (_nd - 2))

    in_specs = [
        pl.BlockSpec((1, B, S, D), lambda m, l: (m, 0, 0, 0)),      # x_emb
        per_layer(enc['ln1_g'].shape),
        per_layer(enc['ln1_b'].shape),
        per_layer(enc['wqkv'].shape),
        per_layer(enc['wo'].shape),
        per_layer(enc['bo'].shape),
        per_layer(enc['ln2_g'].shape),
        per_layer(enc['ln2_b'].shape),
        per_layer(enc['w1'].shape),
        per_layer(enc['b1'].shape),
        per_layer(enc['w2'].shape),
        per_layer(enc['b2'].shape),
        pl.BlockSpec((1, D, LAT_PAD), lambda m, l: (m, 0, 0)),      # w_latent
    ]
    out_spec = pl.BlockSpec((1, B, LAT_PAD), lambda m, l: (m, 0, 0))

    return pl.pallas_call(
        functools.partial(fused_encoder_kernel, heads=heads, depth=depth),
        out_shape=jax.ShapeDtypeStruct((n_mod, B, LAT_PAD), jnp.float32),
        grid=(n_mod, depth),
        in_specs=in_specs,
        out_specs=out_spec,
        scratch_shapes=[pltpu.VMEM((B, S, D), jnp.float32)],
        compiler_params=pltpu.CompilerParams(
            dimension_semantics=("parallel", "arbitrary")),
    )(x_emb, enc['ln1_g'], enc['ln1_b'], enc['wqkv'], enc['wo'], enc['bo'],
      enc['ln2_g'], enc['ln2_b'], enc['w1'], enc['b1'], enc['w2'], enc['b2'],
      w_latent)


def run_clvp_head(latents, temperature):
    n_mod, B, L = latents.shape
    sim = pl.pallas_call(
        clvp_head_kernel,
        out_shape=jax.ShapeDtypeStruct((B, L), jnp.float32),
        grid=(1,),
        in_specs=[pl.BlockSpec((n_mod, B, L), lambda i: (0, 0, 0)),
                  pl.BlockSpec((1, 1), lambda i: (0, 0))],
        out_specs=pl.BlockSpec((B, L), lambda i: (0, 0)),
    )(latents, temperature)
    return sim[:, 0]                                # (B,)


@jax.jit
def clvp_forward(params, text, speech_tokens):
    """Eval-mode CLVP.forward(text, speech_tokens, return_loss=False)."""
    B, St = text.shape
    _, Ss = speech_tokens.shape
    # eval mode: masks are all ones, so mask selects / mask divides are elided.

    # Embedding gathers stay in JAX glue.
    text_emb = params['text_emb'][text] + params['text_pos_emb'][jnp.arange(St)]
    speech_emb = (params['speech_emb'][speech_tokens]
                  + params['speech_pos_emb'][jnp.arange(Ss)])

    x_emb = jnp.stack([text_emb, speech_emb], axis=0)      # (2, B, S, D)

    latents = run_fused_encoders(x_emb, params['enc'], params['w_latent'],
                                 heads=HEADS, depth=DEPTH)

    # TODO(synk): return_loss=True path (symmetric cross-entropy over the full
    # i-j similarity matrix) not implemented; default return_loss=False only.
    return run_clvp_head(latents, params['temperature'])


# ------------------------------ params ---------------------------------------
def init_params(key):
    ks = jax.random.split(key, 9)
    s = 0.02
    d, ff = DIM, DIM * FF_MULT
    enc = {
        'ln1_g': jnp.ones((N_MOD, DEPTH, 1, d), jnp.float32),
        'ln1_b': jnp.zeros((N_MOD, DEPTH, 1, d), jnp.float32),
        'wqkv': s * jax.random.normal(ks[0], (N_MOD, DEPTH, d, 3 * d), jnp.float32),
        'wo': s * jax.random.normal(ks[1], (N_MOD, DEPTH, d, d), jnp.float32),
        'bo': jnp.zeros((N_MOD, DEPTH, 1, d), jnp.float32),
        'ln2_g': jnp.ones((N_MOD, DEPTH, 1, d), jnp.float32),
        'ln2_b': jnp.zeros((N_MOD, DEPTH, 1, d), jnp.float32),
        'w1': s * jax.random.normal(ks[2], (N_MOD, DEPTH, d, ff), jnp.float32),
        'b1': jnp.zeros((N_MOD, DEPTH, 1, ff), jnp.float32),
        'w2': s * jax.random.normal(ks[3], (N_MOD, DEPTH, ff, d), jnp.float32),
        'b2': jnp.zeros((N_MOD, DEPTH, 1, d), jnp.float32),
    }
    # to_text_latent / to_speech_latent stacked; columns zero-padded to 128 lanes.
    w_lat = s * jax.random.normal(ks[4], (N_MOD, d, DIM_LATENT), jnp.float32)
    w_latent = jnp.zeros((N_MOD, d, LAT_PAD), jnp.float32).at[:, :, :DIM_LATENT].set(w_lat)
    return {
        'text_emb': s * jax.random.normal(ks[5], (NUM_TEXT_TOKENS, DIM), jnp.float32),
        'speech_emb': s * jax.random.normal(ks[6], (NUM_SPEECH_TOKENS, DIM), jnp.float32),
        'text_pos_emb': s * jax.random.normal(ks[7], (TEXT_SEQ, DIM), jnp.float32),
        'speech_pos_emb': s * jax.random.normal(ks[8], (NUM_SPEECH_TOKENS, DIM), jnp.float32),
        'enc': enc,
        'w_latent': w_latent,
        'temperature': jnp.ones((1, 1), jnp.float32),
    }


# -------------------------------- main ----------------------------------------
if __name__ == "__main__":
    key = jax.random.PRNGKey(0)
    k_param, k_text, k_speech = jax.random.split(key, 3)

    params = init_params(k_param)
    text = jax.random.randint(k_text, (BATCH, TEXT_SEQ), 0, NUM_TEXT_TOKENS, dtype=jnp.int32)
    speech_tokens = jax.random.randint(k_speech, (BATCH, SPEECH_SEQ), 0, NUM_SPEECH_TOKENS,
                                       dtype=jnp.int32)

    sim = clvp_forward(params, text, speech_tokens)   # (B,) similarity, eval mode
    sim = jax.block_until_ready(sim)
    assert sim.shape == (BATCH,)
    assert bool(jnp.all(jnp.isfinite(sim)))
    print("KERNEL_OK")
</pallas_src>

<mosaic_0001>
module attributes {stable_mosaic.version = 11 : i64} {
  func.func @clvp_head_kernel(%arg0: i32, %arg1: memref<2x2x128xf32, #tpu.memory_space<vmem>>, %arg2: memref<1x1xf32, #tpu.memory_space<vmem>>, %arg3: memref<2x128xf32, #tpu.memory_space<vmem>>) attributes {dimension_semantics = [#tpu.dimension_semantics<arbitrary>], iteration_bounds = array<i64: 1>, scalar_prefetch = 0 : i64, scratch_operands = 0 : i64, tpu.core_type = #tpu.core_type<tc>, window_params = [{pipeline_mode = #tpu.pipeline_mode<synchronous>, transform_indices = @transform_0, window_bounds = array<i64: 2, 2, 128>}, {pipeline_mode = #tpu.pipeline_mode<synchronous>, transform_indices = @transform_1, window_bounds = array<i64: 1, 1>}, {pipeline_mode = #tpu.pipeline_mode<synchronous>, transform_indices = @transform_2, window_bounds = array<i64: 2, 128>}]} {
    %c0 = arith.constant 0 : index
    %c0_0 = arith.constant 0 : index
    %c0_1 = arith.constant 0 : index
    %0 = vector.load %arg1[%c0, %c0_0, %c0_1] : memref<2x2x128xf32, #tpu.memory_space<vmem>>, vector<2x2x128xf32>
    %1 = vector.extract_strided_slice %0 {offsets = [0, 0, 0], sizes = [1, 2, 128], strides = [1, 1, 1]} : vector<2x2x128xf32> to vector<1x2x128xf32>
    %2 = vector.shape_cast %1 : vector<1x2x128xf32> to vector<2x128xf32>
    %3 = vector.extract_strided_slice %0 {offsets = [1, 0, 0], sizes = [1, 2, 128], strides = [1, 1, 1]} : vector<2x2x128xf32> to vector<1x2x128xf32>
    %4 = vector.shape_cast %3 : vector<1x2x128xf32> to vector<2x128xf32>
    %5 = arith.mulf %2, %4 : vector<2x128xf32>
    %cst = arith.constant dense<0.000000e+00> : vector<2xf32>
    %6 = vector.multi_reduction <add>, %5, %cst [1] : vector<2x128xf32> to vector<2xf32>
    %7 = vector.shape_cast %6 : vector<2xf32> to vector<2x1xf32>
    %c0_2 = arith.constant 0 : index
    %c0_3 = arith.constant 0 : index
    %8 = vector.load %arg2[%c0_2, %c0_3] : memref<1x1xf32, #tpu.memory_space<vmem>>, vector<1x1xf32>
    %9 = math.exp %8 : vector<1x1xf32>
    %10 = vector.broadcast %9 : vector<1x1xf32> to vector<2x1xf32>
    %11 = arith.mulf %7, %10 : vector<2x1xf32>
    %12 = vector.shape_cast %11 : vector<2x1xf32> to vector<2x1xf32>
    %13 = vector.broadcast %12 : vector<2x1xf32> to vector<2x128xf32>
    %c0_4 = arith.constant 0 : index
    %c0_5 = arith.constant 0 : index
    %14 = vector.load %arg3[%c0_4, %c0_5] : memref<2x128xf32, #tpu.memory_space<vmem>>, vector<2x128xf32>
    tpu.vector_store %arg3[%c0_4, %c0_5], %13 {strides = array<i32>} : memref<2x128xf32, #tpu.memory_space<vmem>>, vector<2x128xf32>,
    return
  }
  func.func @transform_0(%arg0: i32) -> (i32, i32, i32) {
    %c0_i32 = arith.constant 0 : i32
    %c0_i32_0 = arith.constant 0 : i32
    %c0_i32_1 = arith.constant 0 : i32
    %c0_i32_2 = arith.constant 0 : i32
    return %c0_i32, %c0_i32_0, %c0_i32_1 : i32, i32, i32
  }
  func.func @transform_1(%arg0: i32) -> (i32, i32) {
    %c0_i32 = arith.constant 0 : i32
    %c0_i32_0 = arith.constant 0 : i32
    %c0_i32_1 = arith.constant 0 : i32
    return %c0_i32, %c0_i32_0 : i32, i32
  }
  func.func @transform_2(%arg0: i32) -> (i32, i32) {
    %c0_i32 = arith.constant 0 : i32
    %c0_i32_0 = arith.constant 0 : i32
    %c0_i32_1 = arith.constant 0 : i32
    return %c0_i32, %c0_i32_0 : i32, i32
  }
}

module attributes {stable_mosaic.version = 11 : i64} {
  func.func @fused_encoder_kernel(%arg0: i32, %arg1: i32, %arg2: memref<1x2x8x32xf32, #tpu.memory_space<vmem>>, %arg3: memref<1x1x1x32xf32, #tpu.memory_space<vmem>>, %arg4: memref<1x1x1x32xf32, #tpu.memory_space<vmem>>, %arg5: memref<1x1x32x96xf32, #tpu.memory_space<vmem>>, %arg6: memref<1x1x32x32xf32, #tpu.memory_space<vmem>>, %arg7: memref<1x1x1x32xf32, #tpu.memory_space<vmem>>, %arg8: memref<1x1x1x32xf32, #tpu.memory_space<vmem>>, %arg9: memref<1x1x1x32xf32, #tpu.memory_space<vmem>>, %arg10: memref<1x1x32x128xf32, #tpu.memory_space<vmem>>, %arg11: memref<1x1x1x128xf32, #tpu.memory_space<vmem>>, %arg12: memref<1x1x128x32xf32, #tpu.memory_space<vmem>>, %arg13: memref<1x1x1x32xf32, #tpu.memory_space<vmem>>, %arg14: memref<1x32x128xf32, #tpu.memory_space<vmem>>, %arg15: memref<1x2x128xf32, #tpu.memory_space<vmem>>, %arg16: memref<2x8x32xf32, #tpu.memory_space<vmem>>) attributes {dimension_semantics = [#tpu.dimension_semantics<parallel>, #tpu.dimension_semantics<arbitrary>], iteration_bounds = array<i64: 2, 2>, scalar_prefetch = 0 : i64, scratch_operands = 1 : i64, tpu.core_type = #tpu.core_type<tc>, window_params = [{transform_indices = @transform_0, window_bounds = array<i64: 1, 2, 8, 32>}, {transform_indices = @transform_1, window_bounds = array<i64: 1, 1, 1, 32>}, {transform_indices = @transform_2, window_bounds = array<i64: 1, 1, 1, 32>}, {transform_indices = @transform_3, window_bounds = array<i64: 1, 1, 32, 96>}, {transform_indices = @transform_4, window_bounds = array<i64: 1, 1, 32, 32>}, {transform_indices = @transform_5, window_bounds = array<i64: 1, 1, 1, 32>}, {transform_indices = @transform_6, window_bounds = array<i64: 1, 1, 1, 32>}, {transform_indices = @transform_7, window_bounds = array<i64: 1, 1, 1, 32>}, {transform_indices = @transform_8, window_bounds = array<i64: 1, 1, 32, 128>}, {transform_indices = @transform_9, window_bounds = array<i64: 1, 1, 1, 128>}, {transform_indices = @transform_10, window_bounds = array<i64: 1, 1, 128, 32>}, {transform_indices = @transform_11, window_bounds = array<i64: 1, 1, 1, 32>}, {transform_indices = @transform_12, window_bounds = array<i64: 1, 32, 128>}, {transform_indices = @transform_13, window_bounds = array<i64: 1, 2, 128>}]} {
    %c0_i32 = arith.constant 0 : i32
    %0 = arith.cmpi eq, %arg1, %c0_i32 : i32
    %1 = arith.extui %0 : i1 to i32
    %c0_i32_0 = arith.constant 0 : i32
    %2 = arith.cmpi ne, %1, %c0_i32_0 : i32
    scf.if %2 {
      %c0_88 = arith.constant 0 : index
      %c0_89 = arith.constant 0 : index
      %c0_90 = arith.constant 0 : index
      %c0_91 = arith.constant 0 : index
      %183 = vector.load %arg2[%c0_88, %c0_89, %c0_90, %c0_91] : memref<1x2x8x32xf32, #tpu.memory_space<vmem>>, vector<1x2x8x32xf32>
      %184 = vector.shape_cast %183 : vector<1x2x8x32xf32> to vector<2x8x32xf32>
      %c0_92 = arith.constant 0 : index
      %c0_93 = arith.constant 0 : index
      %c0_94 = arith.constant 0 : index
      %185 = vector.load %arg16[%c0_92, %c0_93, %c0_94] : memref<2x8x32xf32, #tpu.memory_space<vmem>>, vector<2x8x32xf32>
      tpu.vector_store %arg16[%c0_92, %c0_93, %c0_94], %184 {strides = array<i32>} : memref<2x8x32xf32, #tpu.memory_space<vmem>>, vector<2x8x32xf32>,
    } else {
    }
    %c0 = arith.constant 0 : index
    %c0_1 = arith.constant 0 : index
    %c0_2 = arith.constant 0 : index
    %3 = vector.load %arg16[%c0, %c0_1, %c0_2] : memref<2x8x32xf32, #tpu.memory_space<vmem>>, vector<2x8x32xf32>
    %c0_3 = arith.constant 0 : index
    %c0_4 = arith.constant 0 : index
    %c0_5 = arith.constant 0 : index
    %c0_6 = arith.constant 0 : index
    %4 = vector.load %arg3[%c0_3, %c0_4, %c0_5, %c0_6] : memref<1x1x1x32xf32, #tpu.memory_space<vmem>>, vector<1x1x1x32xf32>
    %5 = vector.shape_cast %4 : vector<1x1x1x32xf32> to vector<1x32xf32>
    %c0_7 = arith.constant 0 : index
    %c0_8 = arith.constant 0 : index
    %c0_9 = arith.constant 0 : index
    %c0_10 = arith.constant 0 : index
    %6 = vector.load %arg4[%c0_7, %c0_8, %c0_9, %c0_10] : memref<1x1x1x32xf32, #tpu.memory_space<vmem>>, vector<1x1x1x32xf32>
    %7 = vector.shape_cast %6 : vector<1x1x1x32xf32> to vector<1x32xf32>
    %cst = arith.constant dense<0.000000e+00> : vector<2x8xf32>
    %8 = vector.multi_reduction <add>, %3, %cst [2] : vector<2x8x32xf32> to vector<2x8xf32>
    %9 = vector.shape_cast %8 : vector<2x8xf32> to vector<2x8x1xf32>
    %cst_11 = arith.constant 3.200000e+01 : f32
    %10 = vector.broadcast %cst_11 : f32 to vector<2x8x1xf32>
    %11 = arith.divf %9, %10 : vector<2x8x1xf32>
    %12 = vector.broadcast %11 : vector<2x8x1xf32> to vector<2x8x32xf32>
    %13 = arith.subf %3, %12 : vector<2x8x32xf32>
    %14 = arith.mulf %13, %13 : vector<2x8x32xf32>
    %cst_12 = arith.constant dense<0.000000e+00> : vector<2x8xf32>
    %15 = vector.multi_reduction <add>, %14, %cst_12 [2] : vector<2x8x32xf32> to vector<2x8xf32>
    %16 = vector.shape_cast %15 : vector<2x8xf32> to vector<2x8x1xf32>
    %cst_13 = arith.constant 3.200000e+01 : f32
    %17 = vector.broadcast %cst_13 : f32 to vector<2x8x1xf32>
    %18 = arith.divf %16, %17 : vector<2x8x1xf32>
    %19 = vector.broadcast %11 : vector<2x8x1xf32> to vector<2x8x32xf32>
    %20 = arith.subf %3, %19 : vector<2x8x32xf32>
    %cst_14 = arith.constant 9.99999974E-6 : f32
    %21 = vector.broadcast %cst_14 : f32 to vector<2x8x1xf32>
    %22 = arith.addf %18, %21 : vector<2x8x1xf32>
    %23 = math.rsqrt %22 : vector<2x8x1xf32>
    %24 = vector.broadcast %23 : vector<2x8x1xf32> to vector<2x8x32xf32>
    %25 = arith.mulf %20, %24 : vector<2x8x32xf32>
    %26 = vector.shape_cast %5 : vector<1x32xf32> to vector<1x1x32xf32>
    %27 = vector.broadcast %26 : vector<1x1x32xf32> to vector<2x8x32xf32>
    %28 = arith.mulf %25, %27 : vector<2x8x32xf32>
    %29 = vector.shape_cast %7 : vector<1x32xf32> to vector<1x1x32xf32>
    %30 = vector.broadcast %29 : vector<1x1x32xf32> to vector<2x8x32xf32>
    %31 = arith.addf %28, %30 : vector<2x8x32xf32>
    %32 = vector.shape_cast %31 : vector<2x8x32xf32> to vector<16x32xf32>
    %c0_15 = arith.constant 0 : index
    %c0_16 = arith.constant 0 : index
    %c0_17 = arith.constant 0 : index
    %c0_18 = arith.constant 0 : index
    %33 = vector.load %arg5[%c0_15, %c0_16, %c0_17, %c0_18] : memref<1x1x32x96xf32, #tpu.memory_space<vmem>>, vector<1x1x32x96xf32>
    %34 = vector.shape_cast %33 : vector<1x1x32x96xf32> to vector<32x96xf32>
    %cst_19 = arith.constant dense<0.000000e+00> : vector<16x96xf32>
    %35 = tpu.matmul %32, %34, %cst_19 {dimension_numbers = #tpu.dot_dimension_numbers<[1], [0], [0], [1], [0, 0, 1, 1], [], []>} : vector<16x32xf32>, vector<32x96xf32>, vector<16x96xf32> -> vector<16x96xf32>
    %36 = vector.extract_strided_slice %35 {offsets = [0, 0], sizes = [16, 32], strides = [1, 1]} : vector<16x96xf32> to vector<16x32xf32>
    %37 = vector.shape_cast %36 : vector<16x32xf32> to vector<2x8x32xf32>
    %38 = vector.extract_strided_slice %35 {offsets = [0, 32], sizes = [16, 32], strides = [1, 1]} : vector<16x96xf32> to vector<16x32xf32>
    %39 = vector.shape_cast %38 : vector<16x32xf32> to vector<2x8x32xf32>
    %40 = vector.extract_strided_slice %35 {offsets = [0, 64], sizes = [16, 32], strides = [1, 1]} : vector<16x96xf32> to vector<16x32xf32>
    %41 = vector.shape_cast %40 : vector<16x32xf32> to vector<2x8x32xf32>
    %42 = vector.extract_strided_slice %37 {offsets = [0, 0, 0], sizes = [2, 8, 8], strides = [1, 1, 1]} : vector<2x8x32xf32> to vector<2x8x8xf32>
    %43 = vector.extract_strided_slice %39 {offsets = [0, 0, 0], sizes = [2, 8, 8], strides = [1, 1, 1]} : vector<2x8x32xf32> to vector<2x8x8xf32>
    "tpu.trace_start"() <{level = 10 : i32, message = "bqd,bkd->bqk"}> : () -> ()
    %cst_20 = arith.constant dense<0.000000e+00> : vector<2x8x8xf32>
    %44 = tpu.matmul %42, %43, %cst_20 {dimension_numbers = #tpu.dot_dimension_numbers<[2], [2], [1], [1], [0, 0, 0, 1, 1, 1], [0], [0]>} : vector<2x8x8xf32>, vector<2x8x8xf32>, vector<2x8x8xf32> -> vector<2x8x8xf32>
    "tpu.trace_stop"() : () -> ()
    %cst_21 = arith.constant 0.353553385 : f32
    %45 = vector.broadcast %cst_21 : f32 to vector<2x8x8xf32>
    %46 = arith.mulf %44, %45 : vector<2x8x8xf32>
    %cst_22 = arith.constant dense<0xFF800000> : vector<2x8xf32>
    %47 = vector.multi_reduction <maximumf>, %46, %cst_22 [2] : vector<2x8x8xf32> to vector<2x8xf32>
    %48 = vector.shape_cast %47 : vector<2x8xf32> to vector<2x8x1xf32>
    %49 = vector.broadcast %48 : vector<2x8x1xf32> to vector<2x8x8xf32>
    %50 = arith.subf %46, %49 : vector<2x8x8xf32>
    %51 = math.exp %50 : vector<2x8x8xf32>
    %cst_23 = arith.constant dense<0.000000e+00> : vector<2x8xf32>
    %52 = vector.multi_reduction <add>, %51, %cst_23 [2] : vector<2x8x8xf32> to vector<2x8xf32>
    %53 = vector.shape_cast %52 : vector<2x8xf32> to vector<2x8x1xf32>
    %54 = tpu.reciprocal %53 {approx = true} : vector<2x8x1xf32> -> vector<2x8x1xf32>
    %55 = vector.broadcast %54 : vector<2x8x1xf32> to vector<2x8x8xf32>
    %56 = arith.mulf %51, %55 : vector<2x8x8xf32>
    %57 = vector.extract_strided_slice %41 {offsets = [0, 0, 0], sizes = [2, 8, 8], strides = [1, 1, 1]} : vector<2x8x32xf32> to vector<2x8x8xf32>
    "tpu.trace_start"() <{level = 10 : i32, message = "bqk,bkd->bqd"}> : () -> ()
    %cst_24 = arith.constant dense<0.000000e+00> : vector<2x8x8xf32>
    %58 = tpu.matmul %56, %57, %cst_24 {dimension_numbers = #tpu.dot_dimension_numbers<[2], [1], [1], [2], [0, 0, 0, 1, 1, 2], [0], [0]>} : vector<2x8x8xf32>, vector<2x8x8xf32>, vector<2x8x8xf32> -> vector<2x8x8xf32>
    "tpu.trace_stop"() : () -> ()
    %59 = vector.extract_strided_slice %37 {offsets = [0, 0, 8], sizes = [2, 8, 8], strides = [1, 1, 1]} : vector<2x8x32xf32> to vector<2x8x8xf32>
    %60 = vector.extract_strided_slice %39 {offsets = [0, 0, 8], sizes = [2, 8, 8], strides = [1, 1, 1]} : vector<2x8x32xf32> to vector<2x8x8xf32>
    "tpu.trace_start"() <{level = 10 : i32, message = "bqd,bkd->bqk"}> : () -> ()
    %cst_25 = arith.constant dense<0.000000e+00> : vector<2x8x8xf32>
    %61 = tpu.matmul %59, %60, %cst_25 {dimension_numbers = #tpu.dot_dimension_numbers<[2], [2], [1], [1], [0, 0, 0, 1, 1, 1], [0], [0]>} : vector<2x8x8xf32>, vector<2x8x8xf32>, vector<2x8x8xf32> -> vector<2x8x8xf32>
    "tpu.trace_stop"() : () -> ()
    %cst_26 = arith.constant 0.353553385 : f32
    %62 = vector.broadcast %cst_26 : f32 to vector<2x8x8xf32>
    %63 = arith.mulf %61, %62 : vector<2x8x8xf32>
    %cst_27 = arith.constant dense<0xFF800000> : vector<2x8xf32>
    %64 = vector.multi_reduction <maximumf>, %63, %cst_27 [2] : vector<2x8x8xf32> to vector<2x8xf32>
    %65 = vector.shape_cast %64 : vector<2x8xf32> to vector<2x8x1xf32>
    %66 = vector.broadcast %65 : vector<2x8x1xf32> to vector<2x8x8xf32>
    %67 = arith.subf %63, %66 : vector<2x8x8xf32>
    %68 = math.exp %67 : vector<2x8x8xf32>
    %cst_28 = arith.constant dense<0.000000e+00> : vector<2x8xf32>
    %69 = vector.multi_reduction <add>, %68, %cst_28 [2] : vector<2x8x8xf32> to vector<2x8xf32>
    %70 = vector.shape_cast %69 : vector<2x8xf32> to vector<2x8x1xf32>
    %71 = tpu.reciprocal %70 {approx = true} : vector<2x8x1xf32> -> vector<2x8x1xf32>
    %72 = vector.broadcast %71 : vector<2x8x1xf32> to vector<2x8x8xf32>
    %73 = arith.mulf %68, %72 : vector<2x8x8xf32>
    %74 = vector.extract_strided_slice %41 {offsets = [0, 0, 8], sizes = [2, 8, 8], strides = [1, 1, 1]} : vector<2x8x32xf32> to vector<2x8x8xf32>
    "tpu.trace_start"() <{level = 10 : i32, message = "bqk,bkd->bqd"}> : () -> ()
    %cst_29 = arith.constant dense<0.000000e+00> : vector<2x8x8xf32>
    %75 = tpu.matmul %73, %74, %cst_29 {dimension_numbers = #tpu.dot_dimension_numbers<[2], [1], [1], [2], [0, 0, 0, 1, 1, 2], [0], [0]>} : vector<2x8x8xf32>, vector<2x8x8xf32>, vector<2x8x8xf32> -> vector<2x8x8xf32>
    "tpu.trace_stop"() : () -> ()
    %76 = vector.extract_strided_slice %37 {offsets = [0, 0, 16], sizes = [2, 8, 8], strides = [1, 1, 1]} : vector<2x8x32xf32> to vector<2x8x8xf32>
    %77 = vector.extract_strided_slice %39 {offsets = [0, 0, 16], sizes = [2, 8, 8], strides = [1, 1, 1]} : vector<2x8x32xf32> to vector<2x8x8xf32>
    "tpu.trace_start"() <{level = 10 : i32, message = "bqd,bkd->bqk"}> : () -> ()
    %cst_30 = arith.constant dense<0.000000e+00> : vector<2x8x8xf32>
    %78 = tpu.matmul %76, %77, %cst_30 {dimension_numbers = #tpu.dot_dimension_numbers<[2], [2], [1], [1], [0, 0, 0, 1, 1, 1], [0], [0]>} : vector<2x8x8xf32>, vector<2x8x8xf32>, vector<2x8x8xf32> -> vector<2x8x8xf32>
    "tpu.trace_stop"() : () -> ()
    %cst_31 = arith.constant 0.353553385 : f32
    %79 = vector.broadcast %cst_31 : f32 to vector<2x8x8xf32>
    %80 = arith.mulf %78, %79 : vector<2x8x8xf32>
    %cst_32 = arith.constant dense<0xFF800000> : vector<2x8xf32>
    %81 = vector.multi_reduction <maximumf>, %80, %cst_32 [2] : vector<2x8x8xf32> to vector<2x8xf32>
    %82 = vector.shape_cast %81 : vector<2x8xf32> to vector<2x8x1xf32>
    %83 = vector.broadcast %82 : vector<2x8x1xf32> to vector<2x8x8xf32>
    %84 = arith.subf %80, %83 : vector<2x8x8xf32>
    %85 = math.exp %84 : vector<2x8x8xf32>
    %cst_33 = arith.constant dense<0.000000e+00> : vector<2x8xf32>
    %86 = vector.multi_reduction <add>, %85, %cst_33 [2] : vector<2x8x8xf32> to vector<2x8xf32>
    %87 = vector.shape_cast %86 : vector<2x8xf32> to vector<2x8x1xf32>
    %88 = tpu.reciprocal %87 {approx = true} : vector<2x8x1xf32> -> vector<2x8x1xf32>
    %89 = vector.broadcast %88 : vector<2x8x1xf32> to vector<2x8x8xf32>
    %90 = arith.mulf %85, %89 : vector<2x8x8xf32>
    %91 = vector.extract_strided_slice %41 {offsets = [0, 0, 16], sizes = [2, 8, 8], strides = [1, 1, 1]} : vector<2x8x32xf32> to vector<2x8x8xf32>
    "tpu.trace_start"() <{level = 10 : i32, message = "bqk,bkd->bqd"}> : () -> ()
    %cst_34 = arith.constant dense<0.000000e+00> : vector<2x8x8xf32>
    %92 = tpu.matmul %90, %91, %cst_34 {dimension_numbers = #tpu.dot_dimension_numbers<[2], [1], [1], [2], [0, 0, 0, 1, 1, 2], [0], [0]>} : vector<2x8x8xf32>, vector<2x8x8xf32>, vector<2x8x8xf32> -> vector<2x8x8xf32>
    "tpu.trace_stop"() : () -> ()
    %93 = vector.extract_strided_slice %37 {offsets = [0, 0, 24], sizes = [2, 8, 8], strides = [1, 1, 1]} : vector<2x8x32xf32> to vector<2x8x8xf32>
    %94 = vector.extract_strided_slice %39 {offsets = [0, 0, 24], sizes = [2, 8, 8], strides = [1, 1, 1]} : vector<2x8x32xf32> to vector<2x8x8xf32>
    "tpu.trace_start"() <{level = 10 : i32, message = "bqd,bkd->bqk"}> : () -> ()
    %cst_35 = arith.constant dense<0.000000e+00> : vector<2x8x8xf32>
    %95 = tpu.matmul %93, %94, %cst_35 {dimension_numbers = #tpu.dot_dimension_numbers<[2], [2], [1], [1], [0, 0, 0, 1, 1, 1], [0], [0]>} : vector<2x8x8xf32>, vector<2x8x8xf32>, vector<2x8x8xf32> -> vector<2x8x8xf32>
    "tpu.trace_stop"() : () -> ()
    %cst_36 = arith.constant 0.353553385 : f32
    %96 = vector.broadcast %cst_36 : f32 to vector<2x8x8xf32>
    %97 = arith.mulf %95, %96 : vector<2x8x8xf32>
    %cst_37 = arith.constant dense<0xFF800000> : vector<2x8xf32>
    %98 = vector.multi_reduction <maximumf>, %97, %cst_37 [2] : vector<2x8x8xf32> to vector<2x8xf32>
    %99 = vector.shape_cast %98 : vector<2x8xf32> to vector<2x8x1xf32>
    %100 = vector.broadcast %99 : vector<2x8x1xf32> to vector<2x8x8xf32>
    %101 = arith.subf %97, %100 : vector<2x8x8xf32>
    %102 = math.exp %101 : vector<2x8x8xf32>
    %cst_38 = arith.constant dense<0.000000e+00> : vector<2x8xf32>
    %103 = vector.multi_reduction <add>, %102, %cst_38 [2] : vector<2x8x8xf32> to vector<2x8xf32>
    %104 = vector.shape_cast %103 : vector<2x8xf32> to vector<2x8x1xf32>
    %105 = tpu.reciprocal %104 {approx = true} : vector<2x8x1xf32> -> vector<2x8x1xf32>
    %106 = vector.broadcast %105 : vector<2x8x1xf32> to vector<2x8x8xf32>
    %107 = arith.mulf %102, %106 : vector<2x8x8xf32>
    %108 = vector.extract_strided_slice %41 {offsets = [0, 0, 24], sizes = [2, 8, 8], strides = [1, 1, 1]} : vector<2x8x32xf32> to vector<2x8x8xf32>
    "tpu.trace_start"() <{level = 10 : i32, message = "bqk,bkd->bqd"}> : () -> ()
    %cst_39 = arith.constant dense<0.000000e+00> : vector<2x8x8xf32>
    %109 = tpu.matmul %107, %108, %cst_39 {dimension_numbers = #tpu.dot_dimension_numbers<[2], [1], [1], [2], [0, 0, 0, 1, 1, 2], [0], [0]>} : vector<2x8x8xf32>, vector<2x8x8xf32>, vector<2x8x8xf32> -> vector<2x8x8xf32>
    "tpu.trace_stop"() : () -> ()
    %110 = tpu.concatenate %58, %75, %92, %109 in 2 : vector<2x8x8xf32>, vector<2x8x8xf32>, vector<2x8x8xf32>, vector<2x8x8xf32> -> vector<2x8x32xf32>
    %111 = vector.shape_cast %110 : vector<2x8x32xf32> to vector<16x32xf32>
    %c0_40 = arith.constant 0 : index
    %c0_41 = arith.constant 0 : index
    %c0_42 = arith.constant 0 : index
    %c0_43 = arith.constant 0 : index
    %112 = vector.load %arg6[%c0_40, %c0_41, %c0_42, %c0_43] : memref<1x1x32x32xf32, #tpu.memory_space<vmem>>, vector<1x1x32x32xf32>
    %113 = vector.shape_cast %112 : vector<1x1x32x32xf32> to vector<32x32xf32>
    %cst_44 = arith.constant dense<0.000000e+00> : vector<16x32xf32>
    %114 = tpu.matmul %111, %113, %cst_44 {dimension_numbers = #tpu.dot_dimension_numbers<[1], [0], [0], [1], [0, 0, 1, 1], [], []>} : vector<16x32xf32>, vector<32x32xf32>, vector<16x32xf32> -> vector<16x32xf32>
    %c0_45 = arith.constant 0 : index
    %c0_46 = arith.constant 0 : index
    %c0_47 = arith.constant 0 : index
    %c0_48 = arith.constant 0 : index
    %115 = vector.load %arg7[%c0_45, %c0_46, %c0_47, %c0_48] : memref<1x1x1x32xf32, #tpu.memory_space<vmem>>, vector<1x1x1x32xf32>
    %116 = vector.shape_cast %115 : vector<1x1x1x32xf32> to vector<1x32xf32>
    %117 = vector.broadcast %116 : vector<1x32xf32> to vector<16x32xf32>
    %118 = arith.addf %114, %117 : vector<16x32xf32>
    %119 = vector.shape_cast %118 : vector<16x32xf32> to vector<2x8x32xf32>
    %120 = arith.addf %3, %119 : vector<2x8x32xf32>
    %c0_49 = arith.constant 0 : index
    %c0_50 = arith.constant 0 : index
    %c0_51 = arith.constant 0 : index
    %c0_52 = arith.constant 0 : index
    %121 = vector.load %arg8[%c0_49, %c0_50, %c0_51, %c0_52] : memref<1x1x1x32xf32, #tpu.memory_space<vmem>>, vector<1x1x1x32xf32>
    %122 = vector.shape_cast %121 : vector<1x1x1x32xf32> to vector<1x32xf32>
    %c0_53 = arith.constant 0 : index
    %c0_54 = arith.constant 0 : index
    %c0_55 = arith.constant 0 : index
    %c0_56 = arith.constant 0 : index
    %123 = vector.load %arg9[%c0_53, %c0_54, %c0_55, %c0_56] : memref<1x1x1x32xf32, #tpu.memory_space<vmem>>, vector<1x1x1x32xf32>
    %124 = vector.shape_cast %123 : vector<1x1x1x32xf32> to vector<1x32xf32>
    %cst_57 = arith.constant dense<0.000000e+00> : vector<2x8xf32>
    %125 = vector.multi_reduction <add>, %120, %cst_57 [2] : vector<2x8x32xf32> to vector<2x8xf32>
    %126 = vector.shape_cast %125 : vector<2x8xf32> to vector<2x8x1xf32>
    %cst_58 = arith.constant 3.200000e+01 : f32
    %127 = vector.broadcast %cst_58 : f32 to vector<2x8x1xf32>
    %128 = arith.divf %126, %127 : vector<2x8x1xf32>
    %129 = vector.broadcast %128 : vector<2x8x1xf32> to vector<2x8x32xf32>
    %130 = arith.subf %120, %129 : vector<2x8x32xf32>
    %131 = arith.mulf %130, %130 : vector<2x8x32xf32>
    %cst_59 = arith.constant dense<0.000000e+00> : vector<2x8xf32>
    %132 = vector.multi_reduction <add>, %131, %cst_59 [2] : vector<2x8x32xf32> to vector<2x8xf32>
    %133 = vector.shape_cast %132 : vector<2x8xf32> to vector<2x8x1xf32>
    %cst_60 = arith.constant 3.200000e+01 : f32
    %134 = vector.broadcast %cst_60 : f32 to vector<2x8x1xf32>
    %135 = arith.divf %133, %134 : vector<2x8x1xf32>
    %136 = vector.broadcast %128 : vector<2x8x1xf32> to vector<2x8x32xf32>
    %137 = arith.subf %120, %136 : vector<2x8x32xf32>
    %cst_61 = arith.constant 9.99999974E-6 : f32
    %138 = vector.broadcast %cst_61 : f32 to vector<2x8x1xf32>
    %139 = arith.addf %135, %138 : vector<2x8x1xf32>
    %140 = math.rsqrt %139 : vector<2x8x1xf32>
    %141 = vector.broadcast %140 : vector<2x8x1xf32> to vector<2x8x32xf32>
    %142 = arith.mulf %137, %141 : vector<2x8x32xf32>
    %143 = vector.shape_cast %122 : vector<1x32xf32> to vector<1x1x32xf32>
    %144 = vector.broadcast %143 : vector<1x1x32xf32> to vector<2x8x32xf32>
    %145 = arith.mulf %142, %144 : vector<2x8x32xf32>
    %146 = vector.shape_cast %124 : vector<1x32xf32> to vector<1x1x32xf32>
    %147 = vector.broadcast %146 : vector<1x1x32xf32> to vector<2x8x32xf32>
    %148 = arith.addf %145, %147 : vector<2x8x32xf32>
    %149 = vector.shape_cast %148 : vector<2x8x32xf32> to vector<16x32xf32>
    %c0_62 = arith.constant 0 : index
    %c0_63 = arith.constant 0 : index
    %c0_64 = arith.constant 0 : index
    %c0_65 = arith.constant 0 : index
    %150 = vector.load %arg10[%c0_62, %c0_63, %c0_64, %c0_65] : memref<1x1x32x128xf32, #tpu.memory_space<vmem>>, vector<1x1x32x128xf32>
    %151 = vector.shape_cast %150 : vector<1x1x32x128xf32> to vector<32x128xf32>
    %cst_66 = arith.constant dense<0.000000e+00> : vector<16x128xf32>
    %152 = tpu.matmul %149, %151, %cst_66 {dimension_numbers = #tpu.dot_dimension_numbers<[1], [0], [0], [1], [0, 0, 1, 1], [], []>} : vector<16x32xf32>, vector<32x128xf32>, vector<16x128xf32> -> vector<16x128xf32>
    %c0_67 = arith.constant 0 : index
    %c0_68 = arith.constant 0 : index
    %c0_69 = arith.constant 0 : index
    %c0_70 = arith.constant 0 : index
    %153 = vector.load %arg11[%c0_67, %c0_68, %c0_69, %c0_70] : memref<1x1x1x128xf32, #tpu.memory_space<vmem>>, vector<1x1x1x128xf32>
    %154 = vector.shape_cast %153 : vector<1x1x1x128xf32> to vector<1x128xf32>
    %155 = vector.broadcast %154 : vector<1x128xf32> to vector<16x128xf32>
    %156 = arith.addf %152, %155 : vector<16x128xf32>
    %157 = arith.mulf %156, %156 : vector<16x128xf32>
    %158 = arith.mulf %156, %157 : vector<16x128xf32>
    %cst_71 = arith.constant 4.471500e-02 : f32
    %159 = vector.broadcast %cst_71 : f32 to vector<16x128xf32>
    %160 = arith.mulf %159, %158 : vector<16x128xf32>
    %161 = arith.addf %156, %160 : vector<16x128xf32>
    %cst_72 = arith.constant 0.797884583 : f32
    %162 = vector.broadcast %cst_72 : f32 to vector<16x128xf32>
    %163 = arith.mulf %162, %161 : vector<16x128xf32>
    %164 = math.tanh %163 : vector<16x128xf32>
    %cst_73 = arith.constant 1.000000e+00 : f32
    %165 = vector.broadcast %cst_73 : f32 to vector<16x128xf32>
    %166 = arith.addf %165, %164 : vector<16x128xf32>
    %cst_74 = arith.constant 5.000000e-01 : f32
    %167 = vector.broadcast %cst_74 : f32 to vector<16x128xf32>
    %168 = arith.mulf %167, %166 : vector<16x128xf32>
    %169 = arith.mulf %156, %168 : vector<16x128xf32>
    %c0_75 = arith.constant 0 : index
    %c0_76 = arith.constant 0 : index
    %c0_77 = arith.constant 0 : index
    %c0_78 = arith.constant 0 : index
    %170 = vector.load %arg12[%c0_75, %c0_76, %c0_77, %c0_78] : memref<1x1x128x32xf32, #tpu.memory_space<vmem>>, vector<1x1x128x32xf32>
    %171 = vector.shape_cast %170 : vector<1x1x128x32xf32> to vector<128x32xf32>
    %cst_79 = arith.constant dense<0.000000e+00> : vector<16x32xf32>
    %172 = tpu.matmul %169, %171, %cst_79 {dimension_numbers = #tpu.dot_dimension_numbers<[1], [0], [0], [1], [0, 0, 1, 1], [], []>} : vector<16x128xf32>, vector<128x32xf32>, vector<16x32xf32> -> vector<16x32xf32>
    %c0_80 = arith.constant 0 : index
    %c0_81 = arith.constant 0 : index
    %c0_82 = arith.constant 0 : index
    %c0_83 = arith.constant 0 : index
    %173 = vector.load %arg13[%c0_80, %c0_81, %c0_82, %c0_83] : memref<1x1x1x32xf32, #tpu.memory_space<vmem>>, vector<1x1x1x32xf32>
    %174 = vector.shape_cast %173 : vector<1x1x1x32xf32> to vector<1x32xf32>
    %175 = vector.broadcast %174 : vector<1x32xf32> to vector<16x32xf32>
    %176 = arith.addf %172, %175 : vector<16x32xf32>
    %177 = vector.shape_cast %176 : vector<16x32xf32> to vector<2x8x32xf32>
    %178 = arith.addf %120, %177 : vector<2x8x32xf32>
    %c0_84 = arith.constant 0 : index
    %c0_85 = arith.constant 0 : index
    %c0_86 = arith.constant 0 : index
    %179 = vector.load %arg16[%c0_84, %c0_85, %c0_86] : memref<2x8x32xf32, #tpu.memory_space<vmem>>, vector<2x8x32xf32>
    tpu.vector_store %arg16[%c0_84, %c0_85, %c0_86], %178 {strides = array<i32>} : memref<2x8x32xf32, #tpu.memory_space<vmem>>, vector<2x8x32xf32>,
    %c1_i32 = arith.constant 1 : i32
    %180 = arith.cmpi eq, %arg1, %c1_i32 : i32
    %181 = arith.extui %180 : i1 to i32
    %c0_i32_87 = arith.constant 0 : i32
    %182 = arith.cmpi ne, %181, %c0_i32_87 : i32
    scf.if %182 {
      %cst_88 = arith.constant dense<0.000000e+00> : vector<2x32xf32>
      %183 = vector.multi_reduction <add>, %178, %cst_88 [1] : vector<2x8x32xf32> to vector<2x32xf32>
      %cst_89 = arith.constant 8.000000e+00 : f32
      %184 = vector.broadcast %cst_89 : f32 to vector<2x32xf32>
      %185 = arith.divf %183, %184 : vector<2x32xf32>
      %c0_90 = arith.constant 0 : index
      %c0_91 = arith.constant 0 : index
      %c0_92 = arith.constant 0 : index
      %186 = vector.load %arg14[%c0_90, %c0_91, %c0_92] : memref<1x32x128xf32, #tpu.memory_space<vmem>>, vector<1x32x128xf32>
      %187 = vector.shape_cast %186 : vector<1x32x128xf32> to vector<32x128xf32>
      %cst_93 = arith.constant dense<0.000000e+00> : vector<2x128xf32>
      %188 = tpu.matmul %185, %187, %cst_93 {dimension_numbers = #tpu.dot_dimension_numbers<[1], [0], [0], [1], [0, 0, 1, 1], [], []>} : vector<2x32xf32>, vector<32x128xf32>, vector<2x128xf32> -> vector<2x128xf32>
      %189 = arith.mulf %188, %188 : vector<2x128xf32>
      %cst_94 = arith.constant dense<0.000000e+00> : vector<2xf32>
      %190 = vector.multi_reduction <add>, %189, %cst_94 [1] : vector<2x128xf32> to vector<2xf32>
      %191 = vector.shape_cast %190 : vector<2xf32> to vector<2x1xf32>
      %cst_95 = arith.constant 1.000000e-24 : f32
      %192 = vector.broadcast %cst_95 : f32 to vector<2x1xf32>
      %193 = arith.maximumf %191, %192 : vector<2x1xf32>
      %194 = math.rsqrt %193 : vector<2x1xf32>
      %195 = vector.broadcast %194 : vector<2x1xf32> to vector<2x128xf32>
      %196 = arith.mulf %188, %195 : vector<2x128xf32>
      %c0_96 = arith.constant 0 : index
      %c0_97 = arith.constant 0 : index
      %c0_98 = arith.constant 0 : index
      %197 = vector.load %arg15[%c0_96, %c0_97, %c0_98] : memref<1x2x128xf32, #tpu.memory_space<vmem>>, vector<1x2x128xf32>
      %198 = vector.shape_cast %197 : vector<1x2x128xf32> to vector<2x128xf32>
      %199 = vector.shape_cast %196 : vector<2x128xf32> to vector<1x2x128xf32>
      tpu.vector_store %arg15[%c0_96, %c0_97, %c0_98], %199 {strides = array<i32>} : memref<1x2x128xf32, #tpu.memory_space<vmem>>, vector<1x2x128xf32>,
    } else {
    }
    return
  }
  func.func @transform_0(%arg0: i32, %arg1: i32) -> (i32, i32, i32, i32) {
    %c0_i32 = arith.constant 0 : i32
    %c0_i32_0 = arith.constant 0 : i32
    %c0_i32_1 = arith.constant 0 : i32
    %c0_i32_2 = arith.constant 0 : i32
    return %arg0, %c0_i32, %c0_i32_0, %c0_i32_1 : i32, i32, i32, i32
  }
  func.func @transform_1(%arg0: i32, %arg1: i32) -> (i32, i32, i32, i32) {
    %c0_i32 = arith.constant 0 : i32
    %c0_i32_0 = arith.constant 0 : i32
    %c0_i32_1 = arith.constant 0 : i32
    return %arg0, %arg1, %c0_i32, %c0_i32_0 : i32, i32, i32, i32
  }
  func.func @transform_2(%arg0: i32, %arg1: i32) -> (i32, i32, i32, i32) {
    %c0_i32 = arith.constant 0 : i32
    %c0_i32_0 = arith.constant 0 : i32
    %c0_i32_1 = arith.constant 0 : i32
    return %arg0, %arg1, %c0_i32, %c0_i32_0 : i32, i32, i32, i32
  }
  func.func @transform_3(%arg0: i32, %arg1: i32) -> (i32, i32, i32, i32) {
    %c0_i32 = arith.constant 0 : i32
    %c0_i32_0 = arith.constant 0 : i32
    %c0_i32_1 = arith.constant 0 : i32
    return %arg0, %arg1, %c0_i32, %c0_i32_0 : i32, i32, i32, i32
  }
  func.func @transform_4(%arg0: i32, %arg1: i32) -> (i32, i32, i32, i32) {
    %c0_i32 = arith.constant 0 : i32
    %c0_i32_0 = arith.constant 0 : i32
    %c0_i32_1 = arith.constant 0 : i32
    return %arg0, %arg1, %c0_i32, %c0_i32_0 : i32, i32, i32, i32
  }
  func.func @transform_5(%arg0: i32, %arg1: i32) -> (i32, i32, i32, i32) {
    %c0_i32 = arith.constant 0 : i32
    %c0_i32_0 = arith.constant 0 : i32
    %c0_i32_1 = arith.constant 0 : i32
    return %arg0, %arg1, %c0_i32, %c0_i32_0 : i32, i32, i32, i32
  }
  func.func @transform_6(%arg0: i32, %arg1: i32) -> (i32, i32, i32, i32) {
    %c0_i32 = arith.constant 0 : i32
    %c0_i32_0 = arith.constant 0 : i32
    %c0_i32_1 = arith.constant 0 : i32
    return %arg0, %arg1, %c0_i32, %c0_i32_0 : i32, i32, i32, i32
  }
  func.func @transform_7(%arg0: i32, %arg1: i32) -> (i32, i32, i32, i32) {
    %c0_i32 = arith.constant 0 : i32
    %c0_i32_0 = arith.constant 0 : i32
    %c0_i32_1 = arith.constant 0 : i32
    return %arg0, %arg1, %c0_i32, %c0_i32_0 : i32, i32, i32, i32
  }
  func.func @transform_8(%arg0: i32, %arg1: i32) -> (i32, i32, i32, i32) {
    %c0_i32 = arith.constant 0 : i32
    %c0_i32_0 = arith.constant 0 : i32
    %c0_i32_1 = arith.constant 0 : i32
    return %arg0, %arg1, %c0_i32, %c0_i32_0 : i32, i32, i32, i32
  }
  func.func @transform_9(%arg0: i32, %arg1: i32) -> (i32, i32, i32, i32) {
    %c0_i32 = arith.constant 0 : i32
    %c0_i32_0 = arith.constant 0 : i32
    %c0_i32_1 = arith.constant 0 : i32
    return %arg0, %arg1, %c0_i32, %c0_i32_0 : i32, i32, i32, i32
  }
  func.func @transform_10(%arg0: i32, %arg1: i32) -> (i32, i32, i32, i32) {
    %c0_i32 = arith.constant 0 : i32
    %c0_i32_0 = arith.constant 0 : i32
    %c0_i32_1 = arith.constant 0 : i32
    return %arg0, %arg1, %c0_i32, %c0_i32_0 : i32, i32, i32, i32
  }
  func.func @transform_11(%arg0: i32, %arg1: i32) -> (i32, i32, i32, i32) {
    %c0_i32 = arith.constant 0 : i32
    %c0_i32_0 = arith.constant 0 : i32
    %c0_i32_1 = arith.constant 0 : i32
    return %arg0, %arg1, %c0_i32, %c0_i32_0 : i32, i32, i32, i32
  }
  func.func @transform_12(%arg0: i32, %arg1: i32) -> (i32, i32, i32) {
    %c0_i32 = arith.constant 0 : i32
    %c0_i32_0 = arith.constant 0 : i32
    %c0_i32_1 = arith.constant 0 : i32
    return %arg0, %c0_i32, %c0_i32_0 : i32, i32, i32
  }
  func.func @transform_13(%arg0: i32, %arg1: i32) -> (i32, i32, i32) {
    %c0_i32 = arith.constant 0 : i32
    %c0_i32_0 = arith.constant 0 : i32
    %c0_i32_1 = arith.constant 0 : i32
    return %arg0, %c0_i32, %c0_i32_0 : i32, i32, i32
  }
}

</mosaic_0001>

<bundles_post_ra>
// kernel: clvp_forward.3
= control target key start
LH: loop header
LB: loop body
LE: loop exit
PB: predicated region body
PF: predicated region fallthrough
CT: control target
= control target key end

     0   :  { %vm16_vm0 = vcmask 1041408   ;;  %v44_v5 = vmov 0   ;;  %v24_v8 = vlaneseq  ;;  %s72_s0 = inlined_call_operand.vmem [shape: f32[2,2,128], index: 0, kind: input, shape index: {}]   ;;  %s73_s1 = inlined_call_operand.<no memory space> [shape: f32[1,1], index: 1, kind: input, shape index: {}]   ;;  %s74_s2 = inlined_call_operand.vmem [shape: f32[2,128], index: 2, kind: output, shape index: {}]  }
   0x1   :  { %v13_v0 = vld [vmem:[%s72_s0] sm:$0x3]  ;;  %v14_v1 = vld [vmem:[%s72_s0 + $0x2] sm:$0x3]  ;;  %v7_v2 = vstv %s73_s1  ;;  %41 = vset.pattern.permute.xlu0 %v44_v5 }
   0x2   :  { %v15_v3 = vmul.f32 %v14_v1, %v13_v0  ;;  %8 = vst [vmem:[#allocation2] sm:$0x1] %v7_v2  ;;  %v25_v9 = vshrl.u32 %v24_v8, 7 }
   0x4   :  { %v17_v4 = vsel %vm16_vm0, %v15_v3, 0.0  ;;  %v26_v10 = vsub.s32 0, %v25_v9 }
   0x5   :  { %18 = vadd.xlane.f32.xlu0 %v17_v4 }
   0x9   :  { %v20_v6 = vld [vmem:[#allocation2] sm:$0x1] }
   0xa   :  { %v21_v7 = vmul.f32 1.442695, %v20_v6 }
   0xc   :  { %42 = vpow2.f32 %v21_v7 }
  0x16   :  { %v43_v11 = vpop.eup %42 }
  0x17   :  { %v27_v12 = vrot.slane %v43_v11, %v26_v10 }
  0x92   :  { %v19_v13 = vpop.xlane.xlu0 %18 }
  0x93   :  { %v29_v14 = vmul.f32 %v27_v12, %v19_v13 }
  0x95   :  { %32 = vperm.xlu0 %41, %v29_v14  }
 0x114   :  { %v33_v15 = vpop.permute.xlu0 %32 }
 0x115   :  { %35 = vst [vmem:[%s74_s2] sm:$0x3] %v33_v15 }

// kernel: clvp_forward.2
= control target key start
LH: loop header
LB: loop body
LE: loop exit
PB: predicated region body
PF: predicated region fallthrough
CT: control target
= control target key end

     0   :  { %s3630_s25 = smov 0   ;;  %s3632_s26 = smov 0   ;;  %s3981_s0 = inlined_call_operand.vmem [shape: f32[2,2,8,32], index: 0, kind: input, shape index: {}]   ;;  %s3982_s1 = inlined_call_operand.vmem [shape: f32[2,2,1,32], index: 1, kind: input, shape index: {}]   ;;  %s3983_s2 = inlined_call_operand.vmem [shape: f32[2,2,1,32], index: 2, kind: input, shape index: {}]   ;;  %s3984_s3 = inlined_call_operand.vmem [shape: f32[2,2,32,96], index: 3, kind: input, shape index: {}]   ;;  %s3985_s4 = inlined_call_operand.vmem [shape: f32[2,2,32,32], index: 4, kind: input, shape index: {}]   ;;  %s3986_s5 = inlined_call_operand.vmem [shape: f32[2,2,1,32], index: 5, kind: input, shape index: {}]   ;;  %s3987_s6 = inlined_call_operand.vmem [shape: f32[2,2,1,32], index: 6, kind: input, shape index: {}]   ;;  %s3988_s7 = inlined_call_operand.vmem [shape: f32[2,2,1,32], index: 7, kind: input, shape index: {}]   ;;  %s3989_s8 = inlined_call_operand.vmem [shape: f32[2,2,32,128], index: 8, kind: input, shape index: {}]   ;;  %s3990_s9 = inlined_call_operand.vmem [shape: f32[2,2,1,128], index: 9, kind: input, shape index: {}]   ;;  %s3991_s10 = inlined_call_operand.vmem [shape: f32[2,2,128,32], index: 10, kind: input, shape index: {}]   ;;  %s3992_s11 = inlined_call_operand.vmem [shape: f32[2,2,1,32], index: 11, kind: input, shape index: {}]   ;;  %s3993_s12 = inlined_call_operand.vmem [shape: f32[2,32,128], index: 12, kind: input, shape index: {}]   ;;  %s3994_s13 = inlined_call_operand.vmem [shape: f32[2,2,128], index: 13, kind: output, shape index: {}]  }
   0x1   :  { %3999 = sst [smem:[#allocation9_spill]] %s3981_s0  ;;  %s3634_s27 = smov 0  }
   0x2   :  { %4000 = sst [smem:[#allocation10_spill]] %s3982_s1  ;;  %s3636_s28 = smov 0  }
   0x3   :  { %4001 = sst [smem:[#allocation11_spill]] %s3984_s3  ;;  %s3638_s29 = smov 0  }
   0x4   :  { %4002 = sst [smem:[#allocation12_spill]] %s3985_s4 }
   0x5   :  { %4003 = sst [smem:[#allocation13_spill]] %s3987_s6 }
   0x6   :  { %4004 = sst [smem:[#allocation14_spill]] %s3989_s8 }
   0x7   :  { %4005 = sst [smem:[#allocation15_spill]] %s3991_s10 }
   0x8   :  { %4006 = sst [smem:[#allocation16_spill]] %s3993_s12 }
   0x9   :  { %4007 = sst [smem:[#allocation17_spill]] %s3994_s13 }
   0xa LB: > { %4008 = sst [smem:[#allocation3_spill]] %s3523_s25  ;;  %s32_s30 = sadd.s32 1, %s3531_s27  ;;  %s3539_s29 = sphi %s3638_s29, %s23_s29   ;;  %s3535_s28 = sphi %s3636_s28, %s4037_s28   ;;  %s3531_s27 = sphi %s3634_s27, %s4036_s27   ;;  %s3527_s26 = sphi %s3632_s26, %s4035_s26   ;;  %s3523_s25 = sphi %s3630_s25, %s4034_s25  }
   0xb   : > { %4009 = sst [smem:[#allocation4_spill]] %s3531_s27  ;;  %s35_s14 = sadd.s32 1, %s3535_s28 }
   0xc   : > { %4010 = sst [smem:[#allocation5_spill]] %s3535_s28  ;;  %p33_p0 = scmp.ge.s32.totalorder %s32_s30, 2 }
   0xd   : > { %4011 = sst [smem:[#allocation6_spill]] %s3539_s29  ;;  %p3033_p1 = scmp.ge.s32.totalorder %s3539_s29, 1 }
   0xe   : > { %p571_p2 = scmp.lt.s32.totalorder %s3539_s29, 5  ;;  %s4039_s30 = smov (%p33_p0, %s32_s30), 0 }
   0xf   : > { %4012 = sst [smem:[#allocation7_spill]] %s4039_s30  ;;  %s4041_s14 = smov (!%p33_p0, %s35_s14), %s3535_s28 }
  0x10   : > { %p572_p3 = pnand %p3033_p1, %p571_p2  ;;  %p37_p4 = scmp.ge.s32.totalorder %s4041_s14, 2 }
  0x11   : > { %p704_p5 = scmp.lt.s32.totalorder (!%p572_p3), %s3527_s26, 1  ;;  %p711_p6 = scmp.lt.s32.totalorder (!%p572_p3), %s3523_s25, 1 }
  0x12   : > { %s4043_s14 = smov (%p37_p4, %s4041_s14), 0  ;;  %575 = sbr.rel (%p572_p3) target bundleno = 4533 (0x11b5), region = 72 }
  0x13   : > { %4013 = sst [smem:[#allocation8_spill]] %s4043_s14  ;;  %s4014_s0 = sld [smem:[#allocation9_spill]] (!%p572_p3) }
  0x14   : > { %s4017_s3 = sld [smem:[#allocation11_spill]] (!%p572_p3)  ;;  %s4018_s4 = sld [smem:[#allocation12_spill]] (!%p572_p3) }
  0x15   : > { %s4019_s8 = sld [smem:[#allocation14_spill]] (!%p572_p3)  ;;  %s4023_s12 = sld [smem:[#allocation3_spill]] (!%p572_p3) }
  0x19   : > { %s4045_s26 = smov (!%p704_p5, %s3527_s26), 1 }
  0x1a   : > { %s712_s15 = scalar_select %p711_p6, %s3523_s25, 1 }
  0x1b   : > { %s3100_s16 = sshll.u32 %s4045_s26, 4  ;;  %s3036_s17 = sshll.u32 %s4045_s26, 1 }
  0x1c   : > { %s708_s20 = scalar_lea.vmem %s4014_s0, %s3100_s16  ;;  %s3667_s21 = sadd.s32 %s3036_s17, %s712_s15 }
  0x1d   : > { %s3038_s27 = sshll.u32 %s712_s15, 2  ;;  %s3039_s18 = sshll.u32 %s4045_s26, 3 }
  0x1e   : > { %s729_s16 = sadd.s32 %s3039_s18, %s3038_s27  ;;  %s3051_s13 = sshll.u32 %s712_s15, 4 }
  0x1f   : > { %s3040_s25 = sshll.u32 %s729_s16, 3  ;;  %s3052_s10 = sshll.u32 %s4045_s26, 5 }
  0x20   : > { %s3688_s24 = scalar_lea.vmem %s4017_s3, %s3040_s25  ;;  %s3693_s14 = scalar_lea.vmem %s4018_s4, %s3040_s25 }
  0x21   : > { %s3702_s29 = scalar_lea.vmem %s4019_s8, %s3040_s25  ;;  %s793_s1 = scalar_lea.vmem %s3992_s11, %s3667_s21 }
  0x22   : > { %s784_s30 = sadd.s32 %s3052_s10, %s3051_s13  ;;  %s4020_s27 = sld [smem:[#allocation16_spill]] }
  0x23   : > { %s3053_s0 = sshll.u32 %s784_s30, 3  ;;  %s4021_s16 = sld [smem:[#allocation17_spill]] }
  0x24   : > { %s4022_s15 = sld [smem:[#allocation15_spill]]  ;;  %p3058_p7 = scmp.ne.s32.totalorder %s4023_s12, 0 }
  0x25   : > { %v807_v0 = vld [vmem:[%s708_s20] sm:$0xff] (!%p3058_p7)  ;;  %vm809_vm0 = vcmask (!%p3058_p7), 261120   ;;  %v808_v1 = vld [vmem:[%s708_s20 + $0x8] sm:$0xff] (!%p3058_p7) }
  0x26   : > { %806 = sbr.rel (%p3058_p7) target bundleno = 45 (0x2d), region = 76  ;;  %810 = vst.msk [vmem:[#allocation2] sm:$0xff] (!%p3058_p7), %vm809_vm0, %v807_v0  ;;  %811 = vst.msk [vmem:[#allocation2 + $0x8] sm:$0xff] (!%p3058_p7), %vm809_vm0, %v808_v1 }
  0x28   : > { %s3715_s18 = scalar_lea.vmem %s4020_s27, %s3052_s10 }
  0x29   : > { %s3720_s8 = scalar_lea.vmem %s4021_s16, %s3036_s17 }
  0x2a   : > { %s3725_s26 = scalar_lea.vmem %s4022_s15, %s3053_s0 }
  0x2d PF: > { %v3728_v2 = vld [vmem:[#allocation2] sm:$0xff]  ;;  %vm816_vm1 = vcmask 261120   ;;  %v3730_v3 = vld [vmem:[#allocation2 + $0x8] sm:$0xff]  ;;  %v862_v18 = vld [vmem:[%s3688_s24 + $0x10] sm:$0xff]  ;;  %s4024_s6 = sld [smem:[#allocation10_spill]]  ;;  %s4026_s20 = scalar_lea.vmem %s3983_s2, %s3667_s21  ;;  %v3541_v38 = vmov 0.0  }
  0x2e   : > { %v817_v4 = vsel %vm816_vm1, %v3728_v2, 0.0  ;;  %v820_v5 = vsel %vm816_vm1, %v3730_v3, 0.0  ;;  %v860_v16 = vld [vmem:[%s3688_s24] sm:$0xff]  ;;  %v861_v17 = vld [vmem:[%s3688_s24 + $0x8] sm:$0xff]  ;;  %v863_v20 = vld [vmem:[%s3688_s24 + $0x18] sm:$0xff]  ;;  %3196 = vmatprep.subr.mxu0 %v3541_v38  ;;  %vm3542_vm2 = vmmov 0  }
  0x2f   : > { %818 = vadd.xlane.f32.xlu0 %v817_v4  ;;  %v3334_v19 = vpack.c.bf16 %v861_v17, %v860_v16  ;;  %v3338_v21 = vpack.c.bf16 %v863_v20, %v862_v18  ;;  %v3060_v31 = vld [vmem:[%s4026_s20] ss:$0 sm:$0xff]  ;;  %3198 = vmatprep.mubr.msk.f32.mxu0 %vm3542_vm2, %v3541_v38  ;;  %s3543_s24 = smov 96   ;;  %vm948_vm3 = vcmask 64512   ;;  %s3544_s0 = smov 64   ;;  %vm2301_vm4 = vcmask 195584  }
  0x30   : > { %s3545_s12 = smov 88   ;;  %s3546_s13 = smov 120   ;;  %vm2298_vm5 = vcmask 130048  }
  0x31   : > { %3335 = vmatprep.subr.bf16.mxu1 %v3334_v19  ;;  %s3547_s30 = smov 56   ;;  %s3548_s27 = smov 80  }
  0x32   : > { %3337 = vmatpush3.bf16.msra.mxu1 %v3334_v19  ;;  %s3549_s19 = smov 112   ;;  %s3550_s25 = smov 48  }
  0x33   : > { %821 = vadd.xlane.f32.xlu0 %v820_v5  ;;  %3339 = vmatprep.subr.bf16.mxu1 %v3338_v21  ;;  %s4025_s10 = scalar_lea.vmem %s4024_s6, %s3667_s21  ;;  %s3551_s16 = smov 72  }
  0x34   : > { %v3059_v29 = vld [vmem:[%s4025_s10] ss:$0 sm:$0xff]  ;;  %s3552_s22 = smov 104   ;;  %s3553_s23 = smov 40  }
  0x35   : > { %s3554_s15 = smov 8   ;;  %s3555_s3 = smov 16  }
  0x36   : > { %3341 = vmatpush3.bf16.msra.mxu1 %v3338_v21  ;;  %s3556_s4 = smov 24   ;;  %s4027_s10 = scalar_lea.vmem %s3986_s5, %s3667_s21 }
  0x37   : > { %3186 = vmatprep.subr.mxu1 %v3541_v38  ;;  %s4028_s20 = sld [smem:[#allocation13_spill]] }
  0xbc   : > { %v819_v6 = vpop.xlane.xlu0 %818 }
  0xbd   : > { %v824_v7 = vmul.f32 0.03125, %v819_v6 }
  0xbf   : > { %v826_v8 = vsub.f32 %v3728_v2, %v824_v7 }
  0xc0   : > { %v822_v9 = vpop.xlane.xlu0 %821 }
  0xc1   : > { %v825_v10 = vmul.f32 0.03125, %v822_v9  ;;  %v828_v11 = vmul.f32 %v826_v8, %v826_v8 }
  0xc3   : > { %v827_v12 = vsub.f32 %v3730_v3, %v825_v10  ;;  %v830_v13 = vsel %vm816_vm1, %v828_v11, 0.0 }
  0xc4   : > { %831 = vadd.xlane.f32.xlu1 %v830_v13 }
  0xc5   : > { %v829_v14 = vmul.f32 %v827_v12, %v827_v12 }
  0xc7   : > { %v833_v15 = vsel %vm816_vm1, %v829_v14, 0.0 }
  0xc8   : > { %834 = vadd.xlane.f32.xlu1 %v833_v15 }
 0x151   : > { %v832_v22 = vpop.xlane.xlu1 %831 }
 0x152   : > { %v836_v23 = vmul.f32 0.03125, %v832_v22 }
 0x154   : > { %v838_v24 = vadd.f32 1e-05, %v836_v23 }
 0x155   : > { %v835_v25 = vpop.xlane.xlu1 %834 }
 0x156   : > { %3455 = vrsqrt.f32 %v838_v24  ;;  %v837_v26 = vmul.f32 0.03125, %v835_v25 }
 0x158   : > { %v839_v27 = vadd.f32 1e-05, %v837_v26 }
 0x15a   : > { %3457 = vrsqrt.f32 %v839_v27 }
 0x160   : > { %v3456_v28 = vpop.eup %3455 }
 0x161   : > { %v842_v30 = vmul.f32 %v3456_v28, %v826_v8 }
 0x163   : > { %v850_v32 = vmul.f32 %v3059_v29, %v842_v30 }
 0x164   : > { %v3458_v33 = vpop.eup %3457 }
 0x165   : > { %v843_v34 = vmul.f32 %v3458_v33, %v827_v12  ;;  %v858_v35 = vadd.f32 %v3060_v31, %v850_v32 }
 0x167   : > { %v851_v36 = vmul.f32 %v3059_v29, %v843_v34  ;;  %3183 = vmatprep.mubr.msk.f32.mxu1 %vm816_vm1, %v858_v35 }
 0x169   : > { %v859_v37 = vadd.f32 %v3060_v31, %v851_v36 }
 0x16b   : > { %3184 = vmatmul.mubr.msk.f32.vlgmr.msra.gmra.mrb[0].mxu1 %vm816_vm1, %v859_v37 }
 0x16c   : > { %3188 = vmatprep.mubr.msk.f32.mxu1 %vm3542_vm2, %v3541_v38 }
 0x23e   : > { %v3762_v39 = vpop.f32.mrb[0].mxu1 }
 0x23f   : > { %1024 = vrot.lane.b32.xlu1 %v3762_v39, %s3543_s24  ;;  %v3765_v40 = vpop.f32.mrb[1].mxu1 }
 0x240   : > { %946 = vrot.lane.b32.xlu0 %v3765_v40, %s3543_s24  ;;  %s4029_s24 = scalar_lea.vmem %s4028_s20, %s3667_s21 }
 0x2b1   : > { %v1025_v42 = vpop.permute.xlu1 %1024 }
 0x2b2   : > { %v947_v41 = vpop.permute.xlu0 %946 }
 0x2b3   : > { %3187 = vmatpush3.xpose.msk.msra.mxu1 %vm948_vm3, %v947_v41 }
 0x2b4   : > { %3191 = vmatprep.subr.mxu1 %v3541_v38 }
 0x2b6   : > { %3189 = vmatmul.mubr.msk.f32.vlgmr.msra.gmra.mrb[2].mxu1 %vm948_vm3, %v3765_v40 }
 0x2b7   : > { %3192 = vmatpush3.xpose.msk.msra.mxu1 %vm948_vm3, %v1025_v42  ;;  %3193 = vmatprep.mubr.msk.f32.mxu1 %vm3542_vm2, %v3541_v38 }
 0x2b8   : > { %3201 = vmatprep.subr.mxu1 %v3541_v38 }
 0x2ba   : > { %3194 = vmatmul.mubr.msk.f32.vlgmr.msra.gmra.mrb[4].mxu1 %vm948_vm3, %v3762_v39 }
 0x2bb   : > { %3203 = vmatprep.mubr.msk.f32.mxu1 %vm3542_vm2, %v3541_v38 }
 0x389   : > { %v1019_v43 = vpop.f32.mrb[2].mxu1 }
 0x38a   : > { %v1100_v44 = vmul.f32 0.35355338, %v1019_v43  ;;  %v3190_v45 = vpop.f32.mrb[3].mxu1 }
 0x38c   : > { %v1102_v46 = vsel %vm948_vm3, %v1100_v44, -inf }
 0x38d   : > { %1103 = vmax.xlane.f32.xlu1 %v1102_v46  ;;  %v1096_v47 = vpop.f32.mrb[4].mxu1 }
 0x38e   : > { %v1101_v48 = vmul.f32 0.35355338, %v1096_v47  ;;  %v3195_v49 = vpop.f32.mrb[5].mxu1 }
 0x390   : > { %v1105_v50 = vsel %vm948_vm3, %v1101_v48, -inf }
 0x391   : > { %1106 = vmax.xlane.f32.xlu0 %v1105_v50 }
 0x39e   : > { %1200 = vrot.lane.b32.xlu1 %v3762_v39, %s3544_s0 }
 0x3a2   : > { %1278 = vrot.lane.b32.xlu1 %v3765_v40, %s3545_s12 }
 0x3a6   : > { %1356 = vrot.lane.b32.xlu1 %v3762_v39, %s3545_s12  ;;  %s4030_s12 = scalar_lea.vmem %s3988_s7, %s3667_s21 }
 0x3a7   : > { %1124 = vrot.lane.b32.xlu0 %v3765_v40, %s3544_s0 }
 0x41a   : > { %v1104_v51 = vpop.xlane.xlu1 %1103 }
 0x41b   : > { %v1108_v52 = vsub.f32 %v1100_v44, %v1104_v51 }
 0x41d   : > { %v1110_v53 = vmul.f32 1.442695, %v1108_v52 }
 0x41e   : > { %v1201_v54 = vpop.permute.xlu1 %1200  ;;  %v1107_v55 = vpop.xlane.xlu0 %1106 }
 0x41f   : > { %3459 = vpow2.f32 %v1110_v53  ;;  %v1109_v56 = vsub.f32 %v1101_v48, %v1107_v55  ;;  %3202 = vmatpush3.msra.mxu1 %v1201_v54 }
 0x420   : > { %3211 = vmatprep.subr.mxu1 %v3541_v38 }
 0x421   : > { %v1112_v57 = vmul.f32 1.442695, %v1109_v56 }
 0x422   : > { %v1125_v58 = vpop.permute.xlu0 %1124  ;;  %v1279_v63 = vpop.permute.xlu1 %1278 }
 0x423   : > { %3461 = vpow2.f32 %v1112_v57  ;;  %3197 = vmatpush3.msra.mxu0 %v1125_v58 }
 0x424   : > { %3206 = vmatprep.subr.mxu0 %v3541_v38 }
 0x426   : > { %v1357_v0 = vpop.permute.xlu1 %1356 }
 0x429   : > { %v3460_v59 = vpop.eup %3459 }
 0x42a   : > { %v1114_v60 = vsel %vm948_vm3, %v3460_v59, 0.0 }
 0x42b   : > { %1115 = vadd.xlane.f32.xlu0 %v1114_v60 }
 0x42d   : > { %v3462_v61 = vpop.eup %3461 }
 0x42e   : > { %v1117_v62 = vsel %vm948_vm3, %v3462_v61, 0.0 }
 0x42f   : > { %1118 = vadd.xlane.f32.xlu1 %v1117_v62 }
 0x440   : > { %1354 = vrot.lane.b32.xlu1 %v3762_v39, %s3546_s13 }
 0x441   : > { %1276 = vrot.lane.b32.xlu0 %v3765_v40, %s3546_s13 }
 0x4b8   : > { %v1116_v1 = vpop.xlane.xlu0 %1115 }
 0x4b9   : > { %3463 = vrcp.f32 %v1116_v1 }
 0x4bc   : > { %v1119_v4 = vpop.xlane.xlu1 %1118  ;;  %v1277_v9 = vpop.permute.xlu0 %1276 }
 0x4bd   : > { %3465 = vrcp.f32 %v1119_v4 }
 0x4c0   : > { %v1355_v10 = vpop.permute.xlu1 %1354 }
 0x4c3   : > { %v3464_v5 = vpop.eup %3463 }
 0x4c4   : > { %v1122_v6 = vmul.f32 %v3464_v5, %v3460_v59 }
 0x4c6   : > { %3199 = vmatmul.mubr.msk.f32.vlgmr.msra.gmra.mrb[0].mxu0 %vm948_vm3, %v1122_v6 }
 0x4c7   : > { %v3466_v7 = vpop.eup %3465  ;;  %3207 = vmatpush3.xpose.msk.msra.mxu0 %vm948_vm3, %v1279_v63  ;;  %3208 = vmatprep.mubr.msk.f32.mxu0 %vm3542_vm2, %v3541_v38 }
 0x4c8   : > { %v1123_v8 = vmul.f32 %v3466_v7, %v3462_v61  ;;  %3216 = vmatprep.subr.mxu0 %v3541_v38 }
 0x4ca   : > { %3204 = vmatmul.mubr.msk.f32.vlgmr.msra.gmra.mrb[6].mxu1 %vm948_vm3, %v1123_v8  ;;  %3209 = vmatmul.mubr.msk.f32.vlgmr.msra.gmra.mrb[2].mxu0 %vm948_vm3, %v1277_v9 }
 0x4cb   : > { %3212 = vmatpush3.xpose.msk.msra.mxu1 %vm948_vm3, %v1357_v0  ;;  %3213 = vmatprep.mubr.msk.f32.mxu1 %vm3542_vm2, %v3541_v38 }
 0x4cc   : > { %3221 = vmatprep.subr.mxu1 %v3541_v38  ;;  %3218 = vmatprep.mubr.msk.f32.mxu0 %vm3542_vm2, %v3541_v38 }
 0x4ce   : > { %3214 = vmatmul.mubr.msk.f32.vlgmr.msra.gmra.mrb[8].mxu1 %vm948_vm3, %v1355_v10 }
 0x4cf   : > { %3223 = vmatprep.mubr.msk.f32.mxu1 %vm3542_vm2, %v3541_v38 }
 0x599   : > { %v3808_v11 = vpop.f32.mrb[0].mxu0 }
 0x59a   : > { %v3200_v12 = vpop.f32.mrb[1].mxu0 }
 0x59d   : > { %v3810_v13 = vpop.f32.mrb[6].mxu1  ;;  %v1350_v14 = vpop.f32.mrb[2].mxu0 }
 0x59e   : > { %v1432_v15 = vmul.f32 0.35355338, %v1350_v14  ;;  %v3205_v16 = vpop.f32.mrb[7].mxu1  ;;  %v3210_v17 = vpop.f32.mrb[3].mxu0 }
 0x5a0   : > { %v1434_v18 = vsel %vm948_vm3, %v1432_v15, -inf }
 0x5a1   : > { %1435 = vmax.xlane.f32.xlu0 %v1434_v18  ;;  %v1428_v19 = vpop.f32.mrb[8].mxu1 }
 0x5a2   : > { %v1433_v20 = vmul.f32 0.35355338, %v1428_v19  ;;  %v3215_v21 = vpop.f32.mrb[9].mxu1 }
 0x5a4   : > { %v1437_v22 = vsel %vm948_vm3, %v1433_v20, -inf }
 0x5a5   : > { %1438 = vmax.xlane.f32.xlu1 %v1437_v22 }
 0x5b6   : > { %1532 = vrot.lane.b32.xlu1 %v3762_v39, %s3547_s30 }
 0x5b7   : > { %1456 = vrot.lane.b32.xlu0 %v3765_v40, %s3547_s30 }
 0x5ba   : > { %1610 = vrot.lane.b32.xlu1 %v3765_v40, %s3548_s27 }
 0x5be   : > { %1688 = vrot.lane.b32.xlu1 %v3762_v39, %s3548_s27  ;;  %s4031_s27 = scalar_lea.vmem %s3990_s9, %s3667_s21 }
 0x5c2   : > { %1686 = vrot.lane.b32.xlu1 %v3762_v39, %s3549_s19 }
 0x62e   : > { %v1436_v23 = vpop.xlane.xlu0 %1435 }
 0x62f   : > { %v1440_v24 = vsub.f32 %v1432_v15, %v1436_v23 }
 0x631   : > { %v1442_v25 = vmul.f32 1.442695, %v1440_v24 }
 0x632   : > { %v1457_v26 = vpop.permute.xlu0 %1456  ;;  %v1439_v27 = vpop.xlane.xlu1 %1438 }
 0x633   : > { %3467 = vpow2.f32 %v1442_v25  ;;  %v1441_v28 = vsub.f32 %v1433_v20, %v1439_v27  ;;  %3217 = vmatpush3.msra.mxu0 %v1457_v26 }
 0x634   : > { %3226 = vmatprep.subr.mxu0 %v3541_v38 }
 0x635   : > { %v1444_v29 = vmul.f32 1.442695, %v1441_v28 }
 0x636   : > { %v1533_v30 = vpop.permute.xlu1 %1532 }
 0x637   : > { %3469 = vpow2.f32 %v1444_v29  ;;  %3222 = vmatpush3.msra.mxu1 %v1533_v30 }
 0x638   : > { %3231 = vmatprep.subr.mxu1 %v3541_v38 }
 0x63a   : > { %v1611_v37 = vpop.permute.xlu1 %1610 }
 0x63d   : > { %v3468_v31 = vpop.eup %3467 }
 0x63e   : > { %v1446_v32 = vsel %vm948_vm3, %v3468_v31, 0.0  ;;  %v1689_v44 = vpop.permute.xlu1 %1688 }
 0x63f   : > { %1447 = vadd.xlane.f32.xlu0 %v1446_v32 }
 0x641   : > { %v3470_v33 = vpop.eup %3469 }
 0x642   : > { %v1449_v34 = vsel %vm948_vm3, %v3470_v33, 0.0  ;;  %v1687_v47 = vpop.permute.xlu1 %1686 }
 0x643   : > { %1450 = vadd.xlane.f32.xlu0 %v1449_v34 }
 0x659   : > { %1608 = vrot.lane.b32.xlu0 %v3765_v40, %s3549_s19 }
 0x6cc   : > { %v1448_v35 = vpop.xlane.xlu0 %1447 }
 0x6cd   : > { %3471 = vrcp.f32 %v1448_v35 }
 0x6d0   : > { %v1451_v36 = vpop.xlane.xlu0 %1450 }
 0x6d1   : > { %3473 = vrcp.f32 %v1451_v36 }
 0x6d4   : > { %v1609_v46 = vpop.permute.xlu0 %1608 }
 0x6d7   : > { %v3472_v41 = vpop.eup %3471 }
 0x6d8   : > { %v1454_v42 = vmul.f32 %v3472_v41, %v3468_v31 }
 0x6da   : > { %3219 = vmatmul.mubr.msk.f32.vlgmr.msra.gmra.mrb[4].mxu0 %vm948_vm3, %v1454_v42 }
 0x6db   : > { %v3474_v43 = vpop.eup %3473  ;;  %3227 = vmatpush3.xpose.msk.msra.mxu0 %vm948_vm3, %v1611_v37  ;;  %3228 = vmatprep.mubr.msk.f32.mxu0 %vm3542_vm2, %v3541_v38 }
 0x6dc   : > { %v1455_v45 = vmul.f32 %v3474_v43, %v3470_v33  ;;  %3236 = vmatprep.subr.mxu0 %v3541_v38 }
 0x6de   : > { %3224 = vmatmul.mubr.msk.f32.vlgmr.msra.gmra.mrb[10].mxu1 %vm948_vm3, %v1455_v45  ;;  %3229 = vmatmul.mubr.msk.f32.vlgmr.msra.gmra.mrb[6].mxu0 %vm948_vm3, %v1609_v46 }
 0x6df   : > { %3232 = vmatpush3.xpose.msk.msra.mxu1 %vm948_vm3, %v1689_v44  ;;  %3233 = vmatprep.mubr.msk.f32.mxu1 %vm3542_vm2, %v3541_v38 }
 0x6e0   : > { %3241 = vmatprep.subr.mxu1 %v3541_v38  ;;  %3238 = vmatprep.mubr.msk.f32.mxu0 %vm3542_vm2, %v3541_v38 }
 0x6e2   : > { %3234 = vmatmul.mubr.msk.f32.vlgmr.msra.gmra.mrb[12].mxu1 %vm948_vm3, %v1687_v47 }
 0x6e3   : > { %3243 = vmatprep.mubr.msk.f32.mxu1 %vm3542_vm2, %v3541_v38 }
 0x7ad   : > { %v3840_v48 = vpop.f32.mrb[4].mxu0 }
 0x7ae   : > { %v3220_v49 = vpop.f32.mrb[5].mxu0 }
 0x7b1   : > { %v3842_v50 = vpop.f32.mrb[10].mxu1  ;;  %v1682_v51 = vpop.f32.mrb[6].mxu0 }
 0x7b2   : > { %v1764_v52 = vmul.f32 0.35355338, %v1682_v51  ;;  %v3225_v53 = vpop.f32.mrb[11].mxu1  ;;  %v3230_v54 = vpop.f32.mrb[7].mxu0 }
 0x7b3   : > { %v2304_v53 = vld [vmem:[%s3693_s14] sm:$0xff]  ;;  %v2305_v54 = vld [vmem:[%s3693_s14 + $0x8] sm:$0xff] }
 0x7b4   : > { %v1766_v55 = vsel %vm948_vm3, %v1764_v52, -inf }
 0x7b5   : > { %1767 = vmax.xlane.f32.xlu0 %v1766_v55  ;;  %v1760_v56 = vpop.f32.mrb[12].mxu1  ;;  %v2306_v55 = vld [vmem:[%s3693_s14 + $0x10] sm:$0xff] }
 0x7b6   : > { %v1765_v57 = vmul.f32 0.35355338, %v1760_v56  ;;  %v3235_v58 = vpop.f32.mrb[13].mxu1  ;;  %v2307_v56 = vld [vmem:[%s3693_s14 + $0x18] sm:$0xff] }
 0x7b8   : > { %v1769_v59 = vsel %vm948_vm3, %v1765_v57, -inf }
 0x7b9   : > { %1770 = vmax.xlane.f32.xlu1 %v1769_v59 }
 0x7ca   : > { %1864 = vrot.lane.b32.xlu1 %v3762_v39, %s3550_s25 }
 0x7cb   : > { %1788 = vrot.lane.b32.xlu0 %v3765_v40, %s3550_s25  ;;  %s4032_s25 = sld [smem:[#allocation3_spill]] }
 0x7ce   : > { %1942 = vrot.lane.b32.xlu1 %v3765_v40, %s3551_s16 }
 0x7d1   : > { %p3096_p8 = scmp.ne.s32.totalorder %s4032_s25, 1 }
 0x7d2   : > { %2020 = vrot.lane.b32.xlu1 %v3762_v39, %s3551_s16  ;;  %vm3558_vm6 = vmmov (!%p3096_p8), 0   ;;  %vm2681_vm7 = vcmask (!%p3096_p8), 1041409   ;;  %vm2756_vm8 = vcmask (!%p3096_p8), 1041408  }
 0x7d6   : > { %2018 = vrot.lane.b32.xlu1 %v3762_v39, %s3552_s22 }
 0x842   : > { %v1768_v60 = vpop.xlane.xlu0 %1767 }
 0x843   : > { %v1772_v61 = vsub.f32 %v1764_v52, %v1768_v60 }
 0x845   : > { %v1774_v62 = vmul.f32 1.442695, %v1772_v61 }
 0x846   : > { %v1789_v63 = vpop.permute.xlu0 %1788  ;;  %v1771_v0 = vpop.xlane.xlu1 %1770 }
 0x847   : > { %3475 = vpow2.f32 %v1774_v62  ;;  %v1773_v1 = vsub.f32 %v1765_v57, %v1771_v0  ;;  %3237 = vmatpush3.msra.mxu0 %v1789_v63  ;;  %v3346_v57 = vpack.c.bf16 %v2307_v56, %v2306_v55  ;;  %v2555_v55 = vld [vmem:[%s3725_s26 + $0x18] sm:$0xff] }
 0x848   : > { %3246 = vmatprep.subr.mxu0 %v3541_v38 }
 0x849   : > { %v1776_v4 = vmul.f32 1.442695, %v1773_v1 }
 0x84a   : > { %v1865_v5 = vpop.permute.xlu1 %1864 }
 0x84b   : > { %3477 = vpow2.f32 %v1776_v4  ;;  %3242 = vmatpush3.msra.mxu1 %v1865_v5 }
 0x84c   : > { %3251 = vmatprep.subr.mxu1 %v3541_v38 }
 0x84e   : > { %v1943_v14 = vpop.permute.xlu1 %1942 }
 0x851   : > { %v3476_v6 = vpop.eup %3475 }
 0x852   : > { %v1778_v7 = vsel %vm948_vm3, %v3476_v6, 0.0  ;;  %v2021_v18 = vpop.permute.xlu1 %2020 }
 0x853   : > { %1779 = vadd.xlane.f32.xlu0 %v1778_v7 }
 0x855   : > { %v3478_v8 = vpop.eup %3477 }
 0x856   : > { %v1781_v9 = vsel %vm948_vm3, %v3478_v8, 0.0  ;;  %v2019_v21 = vpop.permute.xlu1 %2018 }
 0x857   : > { %1782 = vadd.xlane.f32.xlu0 %v1781_v9 }
 0x86d   : > { %1940 = vrot.lane.b32.xlu0 %v3765_v40, %s3552_s22 }
 0x8e0   : > { %v1780_v10 = vpop.xlane.xlu0 %1779 }
 0x8e1   : > { %3479 = vrcp.f32 %v1780_v10 }
 0x8e4   : > { %v1783_v12 = vpop.xlane.xlu0 %1782 }
 0x8e5   : > { %3481 = vrcp.f32 %v1783_v12 }
 0x8e8   : > { %v1941_v20 = vpop.permute.xlu0 %1940 }
 0x8eb   : > { %v3480_v15 = vpop.eup %3479 }
 0x8ec   : > { %v1786_v16 = vmul.f32 %v3480_v15, %v3476_v6 }
 0x8ee   : > { %3239 = vmatmul.mubr.msk.f32.vlgmr.msra.gmra.mrb[8].mxu0 %vm948_vm3, %v1786_v16 }
 0x8ef   : > { %v3482_v17 = vpop.eup %3481  ;;  %3247 = vmatpush3.xpose.msk.msra.mxu0 %vm948_vm3, %v1943_v14  ;;  %3248 = vmatprep.mubr.msk.f32.mxu0 %vm3542_vm2, %v3541_v38 }
 0x8f0   : > { %v1787_v19 = vmul.f32 %v3482_v17, %v3478_v8  ;;  %3256 = vmatprep.subr.mxu0 %v3541_v38 }
 0x8f2   : > { %3244 = vmatmul.mubr.msk.f32.vlgmr.msra.gmra.mrb[14].mxu1 %vm948_vm3, %v1787_v19  ;;  %3249 = vmatmul.mubr.msk.f32.vlgmr.msra.gmra.mrb[10].mxu0 %vm948_vm3, %v1941_v20 }
 0x8f3   : > { %3252 = vmatpush3.xpose.msk.msra.mxu1 %vm948_vm3, %v2021_v18  ;;  %3253 = vmatprep.mubr.msk.f32.mxu1 %vm3542_vm2, %v3541_v38 }
 0x8f4   : > { %3261 = vmatprep.subr.mxu1 %v3541_v38  ;;  %3258 = vmatprep.mubr.msk.f32.mxu0 %vm3542_vm2, %v3541_v38 }
 0x8f6   : > { %3254 = vmatmul.mubr.msk.f32.vlgmr.msra.gmra.mrb[16].mxu1 %vm948_vm3, %v2019_v21 }
 0x8f7   : > { %3263 = vmatprep.mubr.msk.f32.mxu1 %vm3542_vm2, %v3541_v38 }
 0x9c1   : > { %v1860_v22 = vpop.f32.mrb[8].mxu0 }
 0x9c2   : > { %v3240_v23 = vpop.f32.mrb[9].mxu0 }
 0x9c5   : > { %v1936_v24 = vpop.f32.mrb[14].mxu1  ;;  %v2014_v25 = vpop.f32.mrb[10].mxu0 }
 0x9c6   : > { %v2096_v26 = vmul.f32 0.35355338, %v2014_v25  ;;  %v3245_v27 = vpop.f32.mrb[15].mxu1  ;;  %v3250_v28 = vpop.f32.mrb[11].mxu0 }
 0x9c8   : > { %v2098_v29 = vsel %vm948_vm3, %v2096_v26, -inf }
 0x9c9   : > { %2099 = vmax.xlane.f32.xlu0 %v2098_v29  ;;  %v2092_v30 = vpop.f32.mrb[16].mxu1  ;;  %v2442_v29 = vld [vmem:[%s3702_s29] sm:$0xff] }
 0x9ca   : > { %v2097_v31 = vmul.f32 0.35355338, %v2092_v30  ;;  %v3255_v32 = vpop.f32.mrb[17].mxu1  ;;  %v2443_v30 = vld [vmem:[%s3702_s29 + $0x8] sm:$0xff] }
 0x9cb   : > { %v2444_v32 = vld [vmem:[%s3702_s29 + $0x10] sm:$0xff] }
 0x9cc   : > { %v2101_v33 = vsel %vm948_vm3, %v2097_v31, -inf }
 0x9cd   : > { %2102 = vmax.xlane.f32.xlu1 %v2101_v33  ;;  %v2445_v33 = vld [vmem:[%s3702_s29 + $0x18] sm:$0xff] }
 0x9de   : > { %2196 = vrot.lane.b32.xlu1 %v3762_v39, %s3553_s23 }
 0x9e2   : > { %2274 = vrot.lane.b32.xlu1 %v3840_v48, %s3554_s15 }
 0x9e6   : > { %2276 = vrot.lane.b32.xlu1 %v3842_v50, %s3554_s15 }
 0x9ea   : > { %2284 = vrot.lane.b32.xlu1 %v1936_v24, %s3555_s3 }
 0xa56   : > { %v2100_v38 = vpop.xlane.xlu0 %2099 }
 0xa57   : > { %v2104_v34 = vsub.f32 %v2096_v26, %v2100_v38  ;;  %v3354_v38 = vpack.c.bf16 %v2445_v33, %v2444_v32 }
 0xa59   : > { %v2106_v35 = vmul.f32 1.442695, %v2104_v34 }
 0xa5a   : > { %v2103_v36 = vpop.xlane.xlu1 %2102 }
 0xa5b   : > { %3483 = vpow2.f32 %v2106_v35  ;;  %v2105_v37 = vsub.f32 %v2097_v31, %v2103_v36  ;;  %v3350_v31 = vpack.c.bf16 %v2443_v30, %v2442_v29 }
 0xa5d   : > { %v2108_v41 = vmul.f32 1.442695, %v2105_v37 }
 0xa5e   : > { %v2197_v42 = vpop.permute.xlu1 %2196 }
 0xa5f   : > { %3485 = vpow2.f32 %v2108_v41  ;;  %3262 = vmatpush3.msra.mxu1 %v2197_v42 }
 0xa62   : > { %v2275_v62 = vpop.permute.xlu1 %2274 }
 0xa63   : > { %v2296_v1 = vsel %vm948_vm3, %v3808_v11, %v2275_v62  ;;  %v3087_v11 = vld [vmem:[%s4027_s10] ss:$0 sm:$0xff] }
 0xa65   : > { %v3484_v43 = vpop.eup %3483 }
 0xa66   : > { %v2110_v39 = vsel %vm948_vm3, %v3484_v43, 0.0  ;;  %v2277_v63 = vpop.permute.xlu1 %2276 }
 0xa67   : > { %2111 = vadd.xlane.f32.xlu0 %v2110_v39  ;;  %v2297_v8 = vsel %vm948_vm3, %v3810_v13, %v2277_v63  ;;  %v3090_v39 = vld [vmem:[%s4029_s24] ss:$0 sm:$0xff] }
 0xa68   : > { %v2560_v63 = vld [vmem:[%s3725_s26 + $0x40] sm:$0xff] }
 0xa69   : > { %v3486_v44 = vpop.eup %3485 }
 0xa6a   : > { %v2113_v45 = vsel %vm948_vm3, %v3486_v44, 0.0  ;;  %v2285_v4 = vpop.permute.xlu1 %2284 }
 0xa6b   : > { %2114 = vadd.xlane.f32.xlu0 %v2113_v45  ;;  %v2300_v9 = vsel %vm2298_vm5, %v2297_v8, %v2285_v4  ;;  %v3091_v45 = vld [vmem:[%s4030_s12] ss:$0 sm:$0xff]  ;;  %v2565_v8 = vld [vmem:[%s3725_s26 + $0x68] sm:$0xff] }
 0xa81   : > { %2120 = vrot.lane.b32.xlu0 %v3765_v40, %s3553_s23  ;;  %v3342_v40 = vpack.c.bf16 %v2305_v54, %v2304_v53  ;;  %v2553_v53 = vld [vmem:[%s3725_s26 + $0x8] sm:$0xff] }
 0xa83   : > { %3343 = vmatprep.subr.bf16.mxu1 %v3342_v40 }
 0xa85   : > { %2282 = vrot.lane.b32.xlu0 %v1860_v22, %s3555_s3 }
 0xaf4   : > { %v2112_v46 = vpop.xlane.xlu0 %2111 }
 0xaf5   : > { %3487 = vrcp.f32 %v2112_v46 }
 0xaf8   : > { %v2115_v47 = vpop.xlane.xlu0 %2114 }
 0xaf9   : > { %3489 = vrcp.f32 %v2115_v47 }
 0xafc   : > { %v2121_v48 = vpop.permute.xlu0 %2120 }
 0xafd   : > { %3257 = vmatpush3.msra.mxu0 %v2121_v48 }
 0xaff   : > { %v3488_v49 = vpop.eup %3487 }
 0xb00   : > { %v2118_v50 = vmul.f32 %v3488_v49, %v3484_v43  ;;  %v2283_v0 = vpop.permute.xlu0 %2282 }
 0xb01   : > { %v2299_v5 = vsel %vm2298_vm5, %v2296_v1, %v2283_v0  ;;  %v2561_v0 = vld [vmem:[%s3725_s26 + $0x48] sm:$0xff]  ;;  %v2562_v1 = vld [vmem:[%s3725_s26 + $0x50] sm:$0xff] }
 0xb02   : > { %3259 = vmatmul.mubr.msk.f32.vlgmr.msra.gmra.mrb[12].mxu0 %vm948_vm3, %v2118_v50  ;;  %v3374_v4 = vpack.c.bf16 %v2561_v0, %v2560_v63 }
 0xb03   : > { %v3490_v51 = vpop.eup %3489 }
 0xb04   : > { %v2119_v52 = vmul.f32 %v3490_v51, %v3486_v44 }
 0xb06   : > { %3264 = vmatmul.mubr.msk.f32.vlgmr.msra.gmra.mrb[18].mxu1 %vm948_vm3, %v2119_v52  ;;  %v2552_v52 = vld [vmem:[%s3725_s26] sm:$0xff] }
 0xb07   : > { %3345 = vmatpush3.bf16.msra.mxu1 %v3342_v40  ;;  %v3358_v54 = vpack.c.bf16 %v2553_v53, %v2552_v52  ;;  %v2554_v40 = vld [vmem:[%s3725_s26 + $0x10] sm:$0xff] }
 0xb08   : > { %3347 = vmatprep.subr.bf16.mxu1 %v3346_v57  ;;  %v3362_v56 = vpack.c.bf16 %v2555_v55, %v2554_v40 }
 0xb09   : > { %3359 = vmatprep.subr.bf16.mxu0 %v3358_v54 }
 0xb0a   : > { %3361 = vmatpush3.bf16.msra.mxu0 %v3358_v54 }
 0xb0b   : > { %3349 = vmatpush3.bf16.msra.mxu1 %v3346_v57  ;;  %3363 = vmatprep.subr.bf16.mxu0 %v3362_v56  ;;  %v2556_v57 = vld [vmem:[%s3725_s26 + $0x20] sm:$0xff] }
 0xb0c   : > { %3351 = vmatprep.subr.bf16.mxu1 %v3350_v31 }
 0xb0e   : > { %3365 = vmatpush3.bf16.msra.mxu0 %v3362_v56 }
 0xbd5   : > { %v2192_v58 = vpop.f32.mrb[12].mxu0 }
 0xbd6   : > { %2290 = vrot.lane.b32.xlu0 %v2192_v58, %s3556_s4  ;;  %v3260_v59 = vpop.f32.mrb[13].mxu0  ;;  %v2557_v58 = vld [vmem:[%s3725_s26 + $0x28] sm:$0xff] }
 0xbd7   : > { %v3366_v59 = vpack.c.bf16 %v2557_v58, %v2556_v57 }
 0xbd9   : > { %v2268_v60 = vpop.f32.mrb[18].mxu1  ;;  %3367 = vmatprep.subr.bf16.mxu0 %v3366_v59 }
 0xbda   : > { %2292 = vrot.lane.b32.xlu1 %v2268_v60, %s3556_s4  ;;  %v3265_v61 = vpop.f32.mrb[19].mxu1  ;;  %3369 = vmatpush3.bf16.msra.mxu0 %v3366_v59  ;;  %v2558_v60 = vld [vmem:[%s3725_s26 + $0x30] sm:$0xff] }
 0xbdb   : > { %v2559_v61 = vld [vmem:[%s3725_s26 + $0x38] sm:$0xff] }
 0xbdc   : > { %v3370_v62 = vpack.c.bf16 %v2559_v61, %v2558_v60 }
 0xbde   : > { %3371 = vmatprep.subr.bf16.mxu0 %v3370_v62 }
 0xbdf   : > { %3373 = vmatpush3.bf16.msra.mxu0 %v3370_v62 }
 0xbe0   : > { %3375 = vmatprep.subr.bf16.mxu0 %v3374_v4 }
 0xbe3   : > { %3377 = vmatpush3.bf16.msra.mxu0 %v3374_v4 }
 0xc48   : > { %v2291_v6 = vpop.permute.xlu0 %2290 }
 0xc49   : > { %v2302_v7 = vsel %vm2301_vm4, %v2299_v5, %v2291_v6  ;;  %v2563_v5 = vld [vmem:[%s3725_s26 + $0x58] sm:$0xff] }
 0xc4a   : > { %3274 = vmatprep.mubr.msk.f32.mxu1 %vm816_vm1, %v2302_v7  ;;  %v3378_v6 = vpack.c.bf16 %v2563_v5, %v2562_v1  ;;  %v2564_v7 = vld [vmem:[%s3725_s26 + $0x60] sm:$0xff] }
 0xc4c   : > { %v2293_v10 = vpop.permute.xlu1 %2292  ;;  %3379 = vmatprep.subr.bf16.mxu0 %v3378_v6 }
 0xc4d   : > { %v2303_v12 = vsel %vm2301_vm4, %v2300_v9, %v2293_v10  ;;  %v3382_v9 = vpack.c.bf16 %v2565_v8, %v2564_v7  ;;  %v2566_v10 = vld [vmem:[%s3725_s26 + $0x70] sm:$0xff]  ;;  %3381 = vmatpush3.bf16.msra.mxu0 %v3378_v6 }
 0xc4e   : > { %3275 = vmatmul.mubr.msk.f32.vlgmr.msra.gmra.mrb[20].mxu1 %vm816_vm1, %v2303_v12  ;;  %v2567_v12 = vld [vmem:[%s3725_s26 + $0x78] sm:$0xff] }
 0xc4f   : > { %3353 = vmatpush3.bf16.msra.mxu1 %v3350_v31  ;;  %3383 = vmatprep.subr.bf16.mxu0 %v3382_v9 }
 0xc50   : > { %3355 = vmatprep.subr.bf16.mxu1 %v3354_v38 }
 0xc51   : > { %3385 = vmatpush3.bf16.msra.mxu0 %v3382_v9 }
 0xc53   : > { %3357 = vmatpush3.bf16.msra.mxu1 %v3354_v38 }
 0xd21   : > { %v3276_v14 = vpop.f32.mrb[20].mxu1 }
 0xd22   : > { %v2393_v15 = vadd.f32 %v3276_v14, %v3087_v11  ;;  %v2387_v16 = vpop.f32.mrb[21].mxu1  ;;  %v3092_v14 = vld [vmem:[%s4031_s27] ss:$0 sm:$0xff] }
 0xd23   : > { %v2388_v17 = vadd.f32 %v3087_v11, %v2387_v16  ;;  %v3386_v11 = vpack.c.bf16 %v2567_v12, %v2566_v10 }
 0xd24   : > { %v3898_v18 = vadd.f32 %v2393_v15, %v3730_v3 }
 0xd25   : > { %v3901_v19 = vadd.f32 %v2388_v17, %v3728_v2  ;;  %3387 = vmatprep.subr.bf16.mxu0 %v3386_v11 }
 0xd26   : > { %v2403_v13 = vsel %vm816_vm1, %v3898_v18, 0.0  ;;  %3389 = vmatpush3.bf16.msra.mxu0 %v3386_v11 }
 0xd27   : > { %2404 = vadd.xlane.f32.xlu1 %v2403_v13  ;;  %v2400_v20 = vsel %vm816_vm1, %v3901_v19, 0.0 }
 0xd28   : > { %2401 = vadd.xlane.f32.xlu0 %v2400_v20 }
 0xdb4   : > { %v2405_v21 = vpop.xlane.xlu1 %2404 }
 0xdb5   : > { %v2407_v22 = vmul.f32 0.03125, %v2405_v21  ;;  %v2402_v23 = vpop.xlane.xlu0 %2401 }
 0xdb6   : > { %v2406_v3 = vmul.f32 0.03125, %v2402_v23 }
 0xdb7   : > { %v2409_v24 = vsub.f32 %v3898_v18, %v2407_v22 }
 0xdb8   : > { %v2408_v2 = vsub.f32 %v3901_v19, %v2406_v3 }
 0xdb9   : > { %v2411_v27 = vmul.f32 %v2409_v24, %v2409_v24 }
 0xdba   : > { %v2410_v25 = vmul.f32 %v2408_v2, %v2408_v2 }
 0xdbb   : > { %v2415_v28 = vsel %vm816_vm1, %v2411_v27, 0.0 }
 0xdbc   : > { %v2412_v26 = vsel %vm816_vm1, %v2410_v25, 0.0 }
 0xdbd   : > { %2413 = vadd.xlane.f32.xlu0 %v2412_v26 }
 0xdc1   : > { %2416 = vadd.xlane.f32.xlu0 %v2415_v28 }
 0xe4a   : > { %v2414_v34 = vpop.xlane.xlu0 %2413 }
 0xe4b   : > { %v2418_v35 = vmul.f32 0.03125, %v2414_v34 }
 0xe4d   : > { %v2420_v36 = vadd.f32 1e-05, %v2418_v35  ;;  %v3095_v35 = vld [vmem:[%s793_s1] ss:$0 sm:$0xff] }
 0xe4e   : > { %v2417_v37 = vpop.xlane.xlu0 %2416 }
 0xe4f   : > { %3491 = vrsqrt.f32 %v2420_v36  ;;  %v2419_v41 = vmul.f32 0.03125, %v2417_v37 }
 0xe51   : > { %v2421_v42 = vadd.f32 1e-05, %v2419_v41 }
 0xe53   : > { %3493 = vrsqrt.f32 %v2421_v42 }
 0xe59   : > { %v3492_v43 = vpop.eup %3491 }
 0xe5a   : > { %v2424_v44 = vmul.f32 %v3492_v43, %v2408_v2 }
 0xe5c   : > { %v2432_v46 = vmul.f32 %v3090_v39, %v2424_v44  ;;  %v2675_v44 = vld [vmem:[%s3715_s18] sm:$0xff] (!%p3096_p8) }
 0xe5d   : > { %v3494_v47 = vpop.eup %3493 }
 0xe5e   : > { %v2425_v48 = vmul.f32 %v3494_v47, %v2409_v24  ;;  %v2440_v49 = vadd.f32 %v3091_v45, %v2432_v46  ;;  %v2677_v46 = vld [vmem:[%s3715_s18 + $0x10] sm:$0xff] (!%p3096_p8)  ;;  %v3557_v47 = vmov (!%p3096_p8), 0.0|0.0  }
 0xe5f   : > { %3390 = vmatprep.subr.bf16.mxu0 (!%p3096_p8), %v3557_v47 }
 0xe60   : > { %v2433_v50 = vmul.f32 %v3090_v39, %v2425_v48  ;;  %3285 = vmatprep.mubr.msk.f32.mxu1 %vm816_vm1, %v2440_v49 }
 0xe62   : > { %v2441_v51 = vadd.f32 %v3091_v45, %v2433_v50  ;;  %v2676_v45 = vld [vmem:[%s3715_s18 + $0x8] sm:$0xff] (!%p3096_p8) }
 0xe63   : > { %v3391_v48 = vpack.c.bf16 (!%p3096_p8), %v2676_v45, %v2675_v44 }
 0xe64   : > { %3286 = vmatmul.mubr.msk.f32.vlgmr.msra.gmra.mrb[22].mxu1 %vm816_vm1, %v2441_v51 }
 0xf37   : > { %v3287_v15 = vpop.f32.mrb[22].mxu1 }
 0xf38   : > { %v2531_v16 = vadd.f32 %v3287_v15, %v3092_v14  ;;  %v2525_v17 = vpop.f32.mrb[23].mxu1 }
 0xf39   : > { %v2526_v13 = vadd.f32 %v3092_v14, %v2525_v17 }
 0xf3a   : > { %v2535_v20 = vmul.f32 %v2531_v16, %v2531_v16 }
 0xf3b   : > { %v2534_v21 = vmul.f32 %v2526_v13, %v2526_v13 }
 0xf3c   : > { %v2537_v22 = vmul.f32 %v2535_v20, %v2531_v16 }
 0xf3d   : > { %v2536_v23 = vmul.f32 %v2534_v21, %v2526_v13 }
 0xf3e   : > { %v2539_v3 = vmul.f32 0.044715, %v2537_v22 }
 0xf3f   : > { %v2538_v24 = vmul.f32 0.044715, %v2536_v23 }
 0xf40   : > { %v2541_v2 = vadd.f32 %v2539_v3, %v2531_v16 }
 0xf41   : > { %v2540_v25 = vadd.f32 %v2538_v24, %v2526_v13 }
 0xf42   : > { %v2543_v26 = vmul.f32 0.7978846, %v2541_v2 }
 0xf43   : > { %v2542_v27 = vmul.f32 0.7978846, %v2540_v25 }
 0xf44   : > { %3495 = vtanh.f32 %v2543_v26 }
 0xf45   : > { %3497 = vtanh.f32 %v2542_v27 }
 0xf4e   : > { %v3496_v28 = vpop.eup %3495 }
 0xf4f   : > { %v3498_v29 = vpop.eup %3497  ;;  %v2547_v30 = vadd.f32 1.0, %v3496_v28 }
 0xf50   : > { %v2546_v31 = vadd.f32 1.0, %v3498_v29 }
 0xf51   : > { %v2549_v32 = vmul.f32 0.5, %v2547_v30 }
 0xf52   : > { %v2548_v33 = vmul.f32 0.5, %v2546_v31 }
 0xf53   : > { %v2551_v34 = vmul.f32 %v2549_v32, %v2531_v16 }
 0xf54   : > { %v2550_v38 = vmul.f32 %v2548_v33, %v2526_v13 }
 0xf56   : > { %3320 = vmatprep.mubr.f32.mxu0 %v2550_v38 }
 0xf57   : > { %3321 = vmatmul.mubr.f32.vlgmr.msra.gmra.mrb[14].mxu0 %v2551_v34 }
 0xf58   : > { %3392 = vmatpush3.bf16.msra.mxu0 (!%p3096_p8), %v3391_v48 }
 0xf59   : > { %3393 = vmatprep.subr.bf16.mxu0 (!%p3096_p8), %v3557_v47 }
0x102a   : > { %v3322_v36 = vpop.f32.mrb[14].mxu0  ;;  %2657 = sbr.rel (%p3096_p8) target bundleno = 4533 (0x11b5), region = 80 }
0x102b   : > { %v2647_v37 = vadd.f32 %v3322_v36, %v3095_v35  ;;  %v2641_v41 = vpop.f32.mrb[15].mxu0 }
0x102c   : > { %v2642_v42 = vadd.f32 %v3095_v35, %v2641_v41 }
0x102d   : > { %v2651_v43 = vadd.f32 %v2647_v37, %v3898_v18  ;;  %v2678_v18 = vld [vmem:[%s3715_s18 + $0x18] sm:$0xff] (!%p3096_p8) }
0x102e   : > { %v2650_v39 = vadd.f32 %v2642_v42, %v3901_v19  ;;  %v3559_v19 = vmov (!%p3096_p8), 0.0   ;;  %v3394_v53 = vpack.c.bf16 (!%p3096_p8), %v2678_v18, %v2677_v46 }
0x102f   : > { %2653 = vst.msk [vmem:[#allocation2 + $0x8] sm:$0xff] %vm816_vm1, %v2651_v43  ;;  %3331 = vmatprep.mubr.msk.f32.mxu0 (!%p3096_p8), %vm3558_vm6, %v3559_v19  ;;  %v2665_v50 = vsel (!%p3096_p8), %vm816_vm1, %v2651_v43, 0.0 }
0x1030   : > { %2652 = vst.msk [vmem:[#allocation2] sm:$0xff] %vm816_vm1, %v2650_v39  ;;  %v2658_v49 = vsel (!%p3096_p8), %vm816_vm1, %v2650_v39, 0.0  ;;  %v2666_v52 = vrot.slane (!%p3096_p8), %v2665_v50, 4  ;;  %3395 = vmatpush3.bf16.msra.mxu0 (!%p3096_p8), %v3394_v53 }
0x1031   : > { %v2659_v51 = vrot.slane %v2658_v49, 4 }
0x1032   : > { %v2667_v40 = vadd.f32 %v2666_v52, %v2665_v50 }
0x1033   : > { %v2660_v54 = vadd.f32 %v2659_v51, %v2658_v49 }
0x1034   : > { %v2668_v56 = vrot.slane %v2667_v40, 2 }
0x1035   : > { %v2661_v55 = vrot.slane %v2660_v54, 2 }
0x1036   : > { %v2669_v58 = vadd.f32 %v2668_v56, %v2667_v40 }
0x1037   : > { %v2662_v57 = vadd.f32 %v2661_v55, %v2660_v54 }
0x1038   : > { %v2670_v60 = vrot.slane %v2669_v58, 1 }
0x1039   : > { %v2663_v59 = vrot.slane %v2662_v57, 1 }
0x103a   : > { %v2671_v62 = vadd.f32 %v2670_v60, %v2669_v58 }
0x103b   : > { %v2664_v61 = vadd.f32 %v2663_v59, %v2662_v57 }
0x103c   : > { %v2674_v0 = vmul.f32 0.125, %v2671_v62 }
0x103d   : > { %v2673_v63 = vmul.f32 0.125, %v2664_v61 }
0x103f   : > { %v2682_v1 = vsel %vm2681_vm7, %v2674_v0, %v2673_v63 }
0x1040   : > { %3332 = vmatmul.mubr.msk.f32.vlgmr.msra.gmra.mrb[0].mxu0 %vm816_vm1, %v2682_v1 }
0x1113   : > { %v2751_v4 = vpop.f32.mrb[0].mxu0 }
0x1114   : > { %v3333_v5 = vpop.f32.mrb[1].mxu0  ;;  %v2755_v6 = vmul.f32 %v2751_v4, %v2751_v4 }
0x1116   : > { %v2757_v7 = vsel %vm2756_vm8, %v2755_v6, 0.0 }
0x1117   : > { %2758 = vadd.xlane.f32.xlu0 %v2757_v7 }
0x11a4   : > { %v2759_v8 = vpop.xlane.xlu0 %2758 }
0x11a5   : > { %v2760_v9 = vmax.f32 %v2759_v8, 1e-24 }
0x11a7   : > { %3499 = vrsqrt.f32 %v2760_v9 }
0x11b1   : > { %v3500_v10 = vpop.eup %3499 }
0x11b2   : > { %v2762_v12 = vmul.f32 %v3500_v10, %v2751_v4 }
0x11b4   : > { %2763 = vst [vmem:[%s3720_s8] sm:$0x3] %v2762_v12 }
0x11b5 PF: > { %s4033_s21 = sld [smem:[#allocation6_spill]]  ;;  %s4034_s25 = sld [smem:[#allocation4_spill]] }
0x11b6   : > { %s4035_s26 = sld [smem:[#allocation5_spill]]  ;;  %s4036_s27 = sld [smem:[#allocation7_spill]] }
0x11b7   : > { %s4037_s28 = sld [smem:[#allocation8_spill]] }
0x11bb   : > { %s23_s29 = sadd.s32 1, %s4033_s21  }
0x11bc   : > { %p20_p9 = scmp.ge.s32.totalorder %s23_s29, 6  }
0x11be   :  { %22 = sbr.rel (!%p20_p9) target bundleno = 10 (0xa), region = 146 }

</bundles_post_ra>
